<compile_context>
chip_gen: v7x
topology: tpu7x:2x2x1
jax: 0.10.0
libtpu: 0.0.40
codegen_flags: <defaults>
</compile_context>

<pallas_src>
import functools

import jax
import jax.numpy as jnp
from jax.experimental import pallas as pl
from jax.experimental.pallas import tpu as pltpu


def _round_up(a, b):
    return (a + b - 1) // b * b


def _softplus(z):
    # numerically stable softplus (matches torch.nn.Softplus, beta=1)
    return jnp.maximum(z, 0.0) + jnp.log(1.0 + jnp.exp(-jnp.abs(z)))


def decoder_kernel(xt_ref, ct_ref,
                   w0_ref, b0_ref,              # netA layer0: (H,2), (H,1)   [x_scale folded]
                   wh_ref, bh_ref,              # netA hidden: (L,H,H), (L,H,1) [alpha folded]
                   w2_ref, b2_ref,              # netA layer2: (2H,H), (2H,1)
                   lnw_ref, lnb_ref,            # netB LayerNorm: (E,1), (E,1)
                   wb1_ref, bb1_ref,            # netB linear1: (H,E), (H,1)
                   wb2_ref, bb2_ref,            # netB linear2: (H,H), (H,1)
                   y_ref,                       # out: (2, tm)  lane-dense
                   *, n_layers, h_dim, eps):
    f32 = jnp.float32
    H = h_dim

    # ---------------- netA layer0: K=2 contraction on the VPU -----------------
    # (a 2-deep MXU push would use ~1.5% of the systolic array)
    xt = xt_ref[...].astype(f32)                                   # (2, tm)
    w0 = w0_ref[...]                                               # (H, 2)
    h = jnp.sin(w0[:, 0:1] * xt[0:1, :] + w0[:, 1:2] * xt[1:2, :] + b0_ref[...])

    # ---------------- netA hidden SIREN layers (alpha folded into wh) ---------
    for l in range(n_layers):
        z = jnp.dot(wh_ref[l], h.astype(wh_ref.dtype),
                    preferred_element_type=f32) + bh_ref[l]
        h = jnp.sin(z)

    # ---------------- netA layer2: single (2H,H)@(H,tm) matmul ----------------
    y1 = jnp.dot(w2_ref[...], h.astype(w2_ref.dtype),
                 preferred_element_type=f32) + b2_ref[...]         # (2H, tm)
    y1a = y1[:H, :]                                                # aligned sublane split
    y1b = y1[H:, :]

    # ---------------- netB: LayerNorm -> Linear -> Softplus -> Linear -> Softplus
    ct = ct_ref[...].astype(f32)                                   # (E, tm)
    mu = jnp.mean(ct, axis=0, keepdims=True)                       # (1, tm)
    var = jnp.mean((ct - mu) * (ct - mu), axis=0, keepdims=True)
    cn = (ct - mu) * jax.lax.rsqrt(var + eps) * lnw_ref[...] + lnb_ref[...]
    h2 = _softplus(jnp.dot(wb1_ref[...], cn.astype(wb1_ref.dtype),
                           preferred_element_type=f32) + bb1_ref[...])
    h2 = _softplus(jnp.dot(wb2_ref[...], h2.astype(wb2_ref.dtype),
                           preferred_element_type=f32) + bb2_ref[...])

    # ---------------- per-row bmm: y[m] = [ <y1a_m, h2_m>, <y1b_m, h2_m> ] -----
    r0 = jnp.sum(y1a * h2, axis=0, keepdims=True)                  # (1, tm)
    r1 = jnp.sum(y1b * h2, axis=0, keepdims=True)                  # (1, tm)
    y_ref[...] = jnp.concatenate([r0, r1], axis=0).astype(y_ref.dtype)


def decoder_forward(x, c, params, *, x_scale, alpha, n_layers, h_dim,
                    eps=1e-5, tm=None, matmul_dtype=jnp.float32):
    """x: (B, N, 2), c: (B, N, embed_dim) -> (B, N, 2).

    params are in native torch orientation: weights (out_features, in_features),
    biases 1-D.  matmul_dtype=jnp.bfloat16 enables the fast MXU path on v6e/v7x
    (f32 accumulation; elementwise math stays f32)."""
    B, N, _ = x.shape
    E = int(c.shape[-1])
    H = int(h_dim)
    L = int(n_layers)
    M = B * N
    f32 = jnp.float32
    cdt = jnp.dtype(matmul_dtype)

    # ------------- row tiling: rows live on the lane axis -> tm multiple of 128
    if tm is None:
        tm = min(512, _round_up(M, 128))       # sweepable; 256-512 amortizes per-step cost
    tm = max(128, _round_up(int(tm), 128))
    M_pad = _round_up(M, tm)                   # zero-pad arbitrary B*N

    xf = x.reshape(M, 2).astype(f32)
    cf = c.reshape(M, E).astype(f32)
    if M_pad != M:
        pad = M_pad - M
        xf = jnp.pad(xf, ((0, pad), (0, 0)))
        cf = jnp.pad(cf, ((0, pad), (0, 0)))
    xt = xf.T                                   # (2, M_pad)
    ct = cf.T                                   # (E, M_pad)  TODO(synk): could be transposed in-kernel to save one HBM round trip

    # ------------- one-time parameter prep (fold scales) ----------------------
    w0 = (params["w0"] * x_scale).astype(f32)          # (H, 2)  layer0 runs on VPU -> keep f32
    b0 = params["b0"].reshape(H, 1).astype(f32)
    if L > 0:
        wh = (params["wh"] * alpha).astype(cdt)        # (L, H, H)
        bh = params["bh"].reshape(L, H, 1).astype(f32)
    else:                                              # keep BlockSpec shapes valid
        wh = jnp.zeros((1, H, H), cdt)
        bh = jnp.zeros((1, H, 1), f32)
    Lb = max(L, 1)
    w2 = params["w2"].astype(cdt)                      # (2H, H)
    b2 = params["b2"].reshape(2 * H, 1).astype(f32)
    lnw = params["ln_w"].reshape(E, 1).astype(f32)
    lnb = params["ln_b"].reshape(E, 1).astype(f32)
    wb1 = params["wb1"].astype(cdt)                    # (H, E)
    bb1 = params["bb1"].reshape(H, 1).astype(f32)
    wb2 = params["wb2"].astype(cdt)                    # (H, H)
    bb2 = params["bb2"].reshape(H, 1).astype(f32)

    kernel = functools.partial(decoder_kernel, n_layers=L, h_dim=H, eps=float(eps))

    grid = (M_pad // tm,)
    c2 = lambda i: (0, 0)                              # constant -> DMA'd once, held resident
    c3 = lambda i: (0, 0, 0)
    in_specs = [
        pl.BlockSpec((2, tm), lambda i: (0, i)),       # x^T tile
        pl.BlockSpec((E, tm), lambda i: (0, i)),       # c^T tile
        pl.BlockSpec((H, 2), c2),
        pl.BlockSpec((H, 1), c2),
        pl.BlockSpec((Lb, H, H), c3),
        pl.BlockSpec((Lb, H, 1), c3),
        pl.BlockSpec((2 * H, H), c2),
        pl.BlockSpec((2 * H, 1), c2),
        pl.BlockSpec((E, 1), c2),
        pl.BlockSpec((E, 1), c2),
        pl.BlockSpec((H, E), c2),
        pl.BlockSpec((H, 1), c2),
        pl.BlockSpec((H, H), c2),
        pl.BlockSpec((H, 1), c2),
    ]
    out_spec = pl.BlockSpec((2, tm), lambda i: (0, i))

    # ------------- VMEM budget (v7x has only 64 MiB/TC) + cost estimate -------
    wsize = cdt.itemsize
    weight_bytes = ((Lb + 3) * H * H + H * E) * wsize \
                   + ((Lb + 7) * H + 2 * E + 2 * H) * 4
    io_per_step = (2 + E + 2) * tm * 4
    act_per_step = 12 * H * tm * 4                     # live-activation headroom
    vmem_est = 2 * io_per_step + 2 * weight_bytes + act_per_step
    vmem_limit = int(min(48 * 1024 * 1024, max(16 * 1024 * 1024, 2 * vmem_est)))

    flops = 2 * M_pad * (2 * H + L * H * H + 2 * H * H + E * H + H * H + 2 * H)
    transcendentals = M_pad * ((L + 1) * H + 4 * H + 1)  # sin + softplus(exp,log) + rsqrt
    bytes_accessed = M_pad * (2 + E + 2) * 4 + weight_bytes
    cost = pl.CostEstimate(flops=int(flops),
                           transcendentals=int(transcendentals),
                           bytes_accessed=int(bytes_accessed))

    yt = pl.pallas_call(
        kernel,
        out_shape=jax.ShapeDtypeStruct((2, M_pad), f32),
        grid_spec=pltpu.PrefetchScalarGridSpec(
            num_scalar_prefetch=0,
            grid=grid,
            in_specs=in_specs,
            out_specs=out_spec,
        ),
        compiler_params=pltpu.CompilerParams(
            dimension_semantics=("parallel",),
            vmem_limit_bytes=vmem_limit),
        cost_estimate=cost,
    )(xt, ct, w0, b0, wh, bh, w2, b2, lnw, lnb, wb1, bb1, wb2, bb2)

    return yt.T[:M].reshape(B, N, 2)


def make_params(key, *, embed_dim, h_dim, n_layers, alpha, gamma):
    """Deterministic synthetic parameters mirroring the torch init.

    Weights in native torch orientation (out_features, in_features); biases 1-D."""
    import numpy as np
    ks = jax.random.split(key, 10)
    H, E, L = h_dim, embed_dim, n_layers
    f32 = jnp.float32

    def u(k, shape, lim):
        return jax.random.uniform(k, shape, f32, -lim, lim)

    # netA layer0 (Sin, is_first=True): weight ~ U(-1/in_dim, 1/in_dim), in_dim=2
    w0 = u(ks[0], (H, 2), 1.0 / 2)
    b0 = u(ks[1], (H,), 1.0 / np.sqrt(2.0))
    # netA hidden Sin layers: weight ~ U(-sqrt(6/H)/alpha, +)
    lim_h = float(np.sqrt(6.0 / H) / alpha)
    wh = u(ks[2], (max(L, 1), H, H), lim_h)[:L]
    bh = u(ks[3], (max(L, 1), H), 1.0 / np.sqrt(float(H)))[:L]
    # netA layer2: weight scaled by gamma, bias zeroed
    w2 = u(ks[4], (2 * H, H), 1.0 / np.sqrt(float(H))) * gamma
    b2 = jnp.zeros((2 * H,), f32)
    # netB LayerNorm: torch defaults weight=1, bias=0
    ln_w = jnp.ones((E,), f32)
    ln_b = jnp.zeros((E,), f32)
    # netB linears (default-ish kaiming-uniform scale)
    wb1 = u(ks[5], (H, E), 1.0 / np.sqrt(float(E)))
    bb1 = u(ks[6], (H,), 1.0 / np.sqrt(float(E)))
    wb2 = u(ks[7], (H, H), 1.0 / np.sqrt(float(H)))
    bb2 = u(ks[8], (H,), 1.0 / np.sqrt(float(H)))
    return dict(w0=w0, b0=b0, wh=wh, bh=bh, w2=w2, b2=b2,
                ln_w=ln_w, ln_b=ln_b, wb1=wb1, bb1=bb1, wb2=wb2, bb2=bb2)


def decoder_reference(x, c, params, *, x_scale, alpha, n_layers, h_dim, eps=1e-5):
    """Pure-JAX reference of the torch forward (HIGHEST-precision matmuls)."""
    hp = jax.lax.Precision.HIGHEST
    B, N, _ = x.shape
    M = B * N
    xf = x.reshape(M, 2)
    cf = c.reshape(M, -1)
    h = jnp.sin(jnp.dot(x_scale * xf, params["w0"].T, precision=hp) + params["b0"])
    for l in range(n_layers):
        h = jnp.sin(jnp.dot(alpha * h, params["wh"][l].T, precision=hp) + params["bh"][l])
    y1 = jnp.dot(h, params["w2"].T, precision=hp) + params["b2"]
    mu = jnp.mean(cf, axis=-1, keepdims=True)
    var = jnp.mean((cf - mu) ** 2, axis=-1, keepdims=True)
    cn = (cf - mu) / jnp.sqrt(var + eps) * params["ln_w"] + params["ln_b"]
    h2 = jax.nn.softplus(jnp.dot(cn, params["wb1"].T, precision=hp) + params["bb1"])
    h2 = jax.nn.softplus(jnp.dot(h2, params["wb2"].T, precision=hp) + params["bb2"])
    ya = jnp.sum(y1[:, :h_dim] * h2, axis=-1)
    yb = jnp.sum(y1[:, h_dim:] * h2, axis=-1)
    return jnp.stack([ya, yb], axis=-1).reshape(B, N, 2)


if __name__ == "__main__":
    # small shapes consistent with the module
    B, N = 2, 8
    embed_dim, h_dim, n_layers = 32, 32, 2
    alpha, gamma, x_scale = 30.0, 0.1, 1.0

    key = jax.random.PRNGKey(0)
    kx, kc, kp = jax.random.split(key, 3)
    x = jax.random.uniform(kx, (B, N, 2), jnp.float32, -1.0, 1.0)   # coordinates
    c = jax.random.normal(kc, (B, N, embed_dim), jnp.float32)       # conditioning codes

    params = make_params(kp, embed_dim=embed_dim, h_dim=h_dim,
                         n_layers=n_layers, alpha=alpha, gamma=gamma)

    y_ref = decoder_reference(x, c, params, x_scale=x_scale, alpha=alpha,
                              n_layers=n_layers, h_dim=h_dim)

    # f32 path (reference-accurate)
    fwd = jax.jit(functools.partial(decoder_forward, x_scale=x_scale, alpha=alpha,
                                    n_layers=n_layers, h_dim=h_dim))
    y = jax.block_until_ready(fwd(x, c, params))
    assert y.shape == (B, N, 2)
    assert jnp.allclose(y, y_ref, atol=2e-3, rtol=2e-3), \
        float(jnp.max(jnp.abs(y - y_ref)))

    # bf16 MXU fast path (f32 accumulation).  SIREN with alpha=30 is precision
    # sensitive, so this is only a loose sanity check.
    fwd_bf16 = jax.jit(functools.partial(decoder_forward, x_scale=x_scale, alpha=alpha,
                                         n_layers=n_layers, h_dim=h_dim,
                                         matmul_dtype=jnp.bfloat16))
    y_bf16 = jax.block_until_ready(fwd_bf16(x, c, params))
    assert bool(jnp.all(jnp.isfinite(y_bf16)))
    assert jnp.allclose(y_bf16, y_ref, atol=0.15, rtol=0.15), \
        float(jnp.max(jnp.abs(y_bf16 - y_ref)))

    print("KERNEL_OK")
</pallas_src>

<mosaic_0001>
module attributes {stable_mosaic.version = 11 : i64} {
  func.func @decoder_kernel(%arg0: i32, %arg1: memref<2x128xf32, #tpu.memory_space<vmem>>, %arg2: memref<32x128xf32, #tpu.memory_space<vmem>>, %arg3: memref<32x2xf32, #tpu.memory_space<vmem>>, %arg4: memref<32x1xf32, #tpu.memory_space<vmem>>, %arg5: memref<2x32x32xf32, #tpu.memory_space<vmem>>, %arg6: memref<2x32x1xf32, #tpu.memory_space<vmem>>, %arg7: memref<64x32xf32, #tpu.memory_space<vmem>>, %arg8: memref<64x1xf32, #tpu.memory_space<vmem>>, %arg9: memref<32x1xf32, #tpu.memory_space<vmem>>, %arg10: memref<32x1xf32, #tpu.memory_space<vmem>>, %arg11: memref<32x32xf32, #tpu.memory_space<vmem>>, %arg12: memref<32x1xf32, #tpu.memory_space<vmem>>, %arg13: memref<32x32xf32, #tpu.memory_space<vmem>>, %arg14: memref<32x1xf32, #tpu.memory_space<vmem>>, %arg15: memref<2x128xf32, #tpu.memory_space<vmem>>) attributes {dimension_semantics = [#tpu.dimension_semantics<parallel>], iteration_bounds = array<i64: 1>, scalar_prefetch = 0 : i64, scratch_operands = 0 : i64, tpu.core_type = #tpu.core_type<tc>, window_params = [{transform_indices = @transform_0, window_bounds = array<i64: 2, 128>}, {transform_indices = @transform_1, window_bounds = array<i64: 32, 128>}, {pipeline_mode = #tpu.pipeline_mode<synchronous>, transform_indices = @transform_2, window_bounds = array<i64: 32, 2>}, {pipeline_mode = #tpu.pipeline_mode<synchronous>, transform_indices = @transform_3, window_bounds = array<i64: 32, 1>}, {pipeline_mode = #tpu.pipeline_mode<synchronous>, transform_indices = @transform_4, window_bounds = array<i64: 2, 32, 32>}, {pipeline_mode = #tpu.pipeline_mode<synchronous>, transform_indices = @transform_5, window_bounds = array<i64: 2, 32, 1>}, {pipeline_mode = #tpu.pipeline_mode<synchronous>, transform_indices = @transform_6, window_bounds = array<i64: 64, 32>}, {pipeline_mode = #tpu.pipeline_mode<synchronous>, transform_indices = @transform_7, window_bounds = array<i64: 64, 1>}, {pipeline_mode = #tpu.pipeline_mode<synchronous>, transform_indices = @transform_8, window_bounds = array<i64: 32, 1>}, {pipeline_mode = #tpu.pipeline_mode<synchronous>, transform_indices = @transform_9, window_bounds = array<i64: 32, 1>}, {pipeline_mode = #tpu.pipeline_mode<synchronous>, transform_indices = @transform_10, window_bounds = array<i64: 32, 32>}, {pipeline_mode = #tpu.pipeline_mode<synchronous>, transform_indices = @transform_11, window_bounds = array<i64: 32, 1>}, {pipeline_mode = #tpu.pipeline_mode<synchronous>, transform_indices = @transform_12, window_bounds = array<i64: 32, 32>}, {pipeline_mode = #tpu.pipeline_mode<synchronous>, transform_indices = @transform_13, window_bounds = array<i64: 32, 1>}, {transform_indices = @transform_14, window_bounds = array<i64: 2, 128>}]} {
    %c0 = arith.constant 0 : index
    %c0_0 = arith.constant 0 : index
    %0 = vector.load %arg1[%c0, %c0_0] : memref<2x128xf32, #tpu.memory_space<vmem>>, vector<2x128xf32>
    %c0_1 = arith.constant 0 : index
    %c0_2 = arith.constant 0 : index
    %1 = vector.load %arg3[%c0_1, %c0_2] : memref<32x2xf32, #tpu.memory_space<vmem>>, vector<32x2xf32>
    %2 = vector.extract_strided_slice %1 {offsets = [0, 0], sizes = [32, 1], strides = [1, 1]} : vector<32x2xf32> to vector<32x1xf32>
    %3 = vector.extract_strided_slice %0 {offsets = [0, 0], sizes = [1, 128], strides = [1, 1]} : vector<2x128xf32> to vector<1x128xf32>
    %4 = vector.broadcast %2 : vector<32x1xf32> to vector<32x128xf32>
    %5 = vector.broadcast %3 : vector<1x128xf32> to vector<32x128xf32>
    %6 = arith.mulf %4, %5 : vector<32x128xf32>
    %7 = vector.extract_strided_slice %1 {offsets = [0, 1], sizes = [32, 1], strides = [1, 1]} : vector<32x2xf32> to vector<32x1xf32>
    %8 = vector.extract_strided_slice %0 {offsets = [1, 0], sizes = [1, 128], strides = [1, 1]} : vector<2x128xf32> to vector<1x128xf32>
    %9 = vector.broadcast %7 : vector<32x1xf32> to vector<32x128xf32>
    %10 = vector.broadcast %8 : vector<1x128xf32> to vector<32x128xf32>
    %11 = arith.mulf %9, %10 : vector<32x128xf32>
    %12 = arith.addf %6, %11 : vector<32x128xf32>
    %c0_3 = arith.constant 0 : index
    %c0_4 = arith.constant 0 : index
    %13 = vector.load %arg4[%c0_3, %c0_4] : memref<32x1xf32, #tpu.memory_space<vmem>>, vector<32x1xf32>
    %14 = vector.broadcast %13 : vector<32x1xf32> to vector<32x128xf32>
    %15 = arith.addf %12, %14 : vector<32x128xf32>
    %16 = math.sin %15 : vector<32x128xf32>
    %c0_5 = arith.constant 0 : index
    %c0_6 = arith.constant 0 : index
    %c0_7 = arith.constant 0 : index
    %17 = vector.load %arg5[%c0_5, %c0_6, %c0_7] : memref<2x32x32xf32, #tpu.memory_space<vmem>>, vector<1x32x32xf32>
    %18 = vector.shape_cast %17 : vector<1x32x32xf32> to vector<32x32xf32>
    %cst = arith.constant dense<0.000000e+00> : vector<32x128xf32>
    %19 = tpu.matmul %18, %16, %cst {dimension_numbers = #tpu.dot_dimension_numbers<[1], [0], [0], [1], [0, 0, 1, 1], [], []>} : vector<32x32xf32>, vector<32x128xf32>, vector<32x128xf32> -> vector<32x128xf32>
    %c0_8 = arith.constant 0 : index
    %c0_9 = arith.constant 0 : index
    %c0_10 = arith.constant 0 : index
    %20 = vector.load %arg6[%c0_8, %c0_9, %c0_10] : memref<2x32x1xf32, #tpu.memory_space<vmem>>, vector<1x32x1xf32>
    %21 = vector.shape_cast %20 : vector<1x32x1xf32> to vector<32x1xf32>
    %22 = vector.broadcast %21 : vector<32x1xf32> to vector<32x128xf32>
    %23 = arith.addf %19, %22 : vector<32x128xf32>
    %24 = math.sin %23 : vector<32x128xf32>
    %c1 = arith.constant 1 : index
    %c0_11 = arith.constant 0 : index
    %c0_12 = arith.constant 0 : index
    %25 = vector.load %arg5[%c1, %c0_11, %c0_12] : memref<2x32x32xf32, #tpu.memory_space<vmem>>, vector<1x32x32xf32>
    %26 = vector.shape_cast %25 : vector<1x32x32xf32> to vector<32x32xf32>
    %cst_13 = arith.constant dense<0.000000e+00> : vector<32x128xf32>
    %27 = tpu.matmul %26, %24, %cst_13 {dimension_numbers = #tpu.dot_dimension_numbers<[1], [0], [0], [1], [0, 0, 1, 1], [], []>} : vector<32x32xf32>, vector<32x128xf32>, vector<32x128xf32> -> vector<32x128xf32>
    %c1_14 = arith.constant 1 : index
    %c0_15 = arith.constant 0 : index
    %c0_16 = arith.constant 0 : index
    %28 = vector.load %arg6[%c1_14, %c0_15, %c0_16] : memref<2x32x1xf32, #tpu.memory_space<vmem>>, vector<1x32x1xf32>
    %29 = vector.shape_cast %28 : vector<1x32x1xf32> to vector<32x1xf32>
    %30 = vector.broadcast %29 : vector<32x1xf32> to vector<32x128xf32>
    %31 = arith.addf %27, %30 : vector<32x128xf32>
    %32 = math.sin %31 : vector<32x128xf32>
    %c0_17 = arith.constant 0 : index
    %c0_18 = arith.constant 0 : index
    %33 = vector.load %arg7[%c0_17, %c0_18] : memref<64x32xf32, #tpu.memory_space<vmem>>, vector<64x32xf32>
    %cst_19 = arith.constant dense<0.000000e+00> : vector<64x128xf32>
    %34 = tpu.matmul %33, %32, %cst_19 {dimension_numbers = #tpu.dot_dimension_numbers<[1], [0], [0], [1], [0, 0, 1, 1], [], []>} : vector<64x32xf32>, vector<32x128xf32>, vector<64x128xf32> -> vector<64x128xf32>
    %c0_20 = arith.constant 0 : index
    %c0_21 = arith.constant 0 : index
    %35 = vector.load %arg8[%c0_20, %c0_21] : memref<64x1xf32, #tpu.memory_space<vmem>>, vector<64x1xf32>
    %36 = vector.broadcast %35 : vector<64x1xf32> to vector<64x128xf32>
    %37 = arith.addf %34, %36 : vector<64x128xf32>
    %38 = vector.extract_strided_slice %37 {offsets = [0, 0], sizes = [32, 128], strides = [1, 1]} : vector<64x128xf32> to vector<32x128xf32>
    %39 = vector.extract_strided_slice %37 {offsets = [32, 0], sizes = [32, 128], strides = [1, 1]} : vector<64x128xf32> to vector<32x128xf32>
    %c0_22 = arith.constant 0 : index
    %c0_23 = arith.constant 0 : index
    %40 = vector.load %arg2[%c0_22, %c0_23] : memref<32x128xf32, #tpu.memory_space<vmem>>, vector<32x128xf32>
    %cst_24 = arith.constant dense<0.000000e+00> : vector<128xf32>
    %41 = vector.multi_reduction <add>, %40, %cst_24 [0] : vector<32x128xf32> to vector<128xf32>
    %42 = vector.shape_cast %41 : vector<128xf32> to vector<1x128xf32>
    %cst_25 = arith.constant 3.200000e+01 : f32
    %43 = vector.broadcast %cst_25 : f32 to vector<1x128xf32>
    %44 = arith.divf %42, %43 : vector<1x128xf32>
    %45 = vector.broadcast %44 : vector<1x128xf32> to vector<32x128xf32>
    %46 = arith.subf %40, %45 : vector<32x128xf32>
    %47 = vector.broadcast %44 : vector<1x128xf32> to vector<32x128xf32>
    %48 = arith.subf %40, %47 : vector<32x128xf32>
    %49 = arith.mulf %46, %48 : vector<32x128xf32>
    %cst_26 = arith.constant dense<0.000000e+00> : vector<128xf32>
    %50 = vector.multi_reduction <add>, %49, %cst_26 [0] : vector<32x128xf32> to vector<128xf32>
    %51 = vector.shape_cast %50 : vector<128xf32> to vector<1x128xf32>
    %cst_27 = arith.constant 3.200000e+01 : f32
    %52 = vector.broadcast %cst_27 : f32 to vector<1x128xf32>
    %53 = arith.divf %51, %52 : vector<1x128xf32>
    %54 = vector.broadcast %44 : vector<1x128xf32> to vector<32x128xf32>
    %55 = arith.subf %40, %54 : vector<32x128xf32>
    %cst_28 = arith.constant 9.99999974E-6 : f32
    %56 = vector.broadcast %cst_28 : f32 to vector<1x128xf32>
    %57 = arith.addf %53, %56 : vector<1x128xf32>
    %58 = math.rsqrt %57 : vector<1x128xf32>
    %59 = vector.broadcast %58 : vector<1x128xf32> to vector<32x128xf32>
    %60 = arith.mulf %55, %59 : vector<32x128xf32>
    %c0_29 = arith.constant 0 : index
    %c0_30 = arith.constant 0 : index
    %61 = vector.load %arg9[%c0_29, %c0_30] : memref<32x1xf32, #tpu.memory_space<vmem>>, vector<32x1xf32>
    %62 = vector.broadcast %61 : vector<32x1xf32> to vector<32x128xf32>
    %63 = arith.mulf %60, %62 : vector<32x128xf32>
    %c0_31 = arith.constant 0 : index
    %c0_32 = arith.constant 0 : index
    %64 = vector.load %arg10[%c0_31, %c0_32] : memref<32x1xf32, #tpu.memory_space<vmem>>, vector<32x1xf32>
    %65 = vector.broadcast %64 : vector<32x1xf32> to vector<32x128xf32>
    %66 = arith.addf %63, %65 : vector<32x128xf32>
    %c0_33 = arith.constant 0 : index
    %c0_34 = arith.constant 0 : index
    %67 = vector.load %arg11[%c0_33, %c0_34] : memref<32x32xf32, #tpu.memory_space<vmem>>, vector<32x32xf32>
    %cst_35 = arith.constant dense<0.000000e+00> : vector<32x128xf32>
    %68 = tpu.matmul %67, %66, %cst_35 {dimension_numbers = #tpu.dot_dimension_numbers<[1], [0], [0], [1], [0, 0, 1, 1], [], []>} : vector<32x32xf32>, vector<32x128xf32>, vector<32x128xf32> -> vector<32x128xf32>
    %c0_36 = arith.constant 0 : index
    %c0_37 = arith.constant 0 : index
    %69 = vector.load %arg12[%c0_36, %c0_37] : memref<32x1xf32, #tpu.memory_space<vmem>>, vector<32x1xf32>
    %70 = vector.broadcast %69 : vector<32x1xf32> to vector<32x128xf32>
    %71 = arith.addf %68, %70 : vector<32x128xf32>
    %cst_38 = arith.constant 0.000000e+00 : f32
    %72 = vector.broadcast %cst_38 : f32 to vector<32x128xf32>
    %73 = arith.maximumf %71, %72 : vector<32x128xf32>
    %74 = math.absf %71 : vector<32x128xf32>
    %cst_39 = arith.constant 0.000000e+00 : f32
    %75 = vector.broadcast %cst_39 : f32 to vector<32x128xf32>
    %76 = arith.subf %75, %74 : vector<32x128xf32>
    %77 = math.exp %76 : vector<32x128xf32>
    %cst_40 = arith.constant 1.000000e+00 : f32
    %78 = vector.broadcast %cst_40 : f32 to vector<32x128xf32>
    %79 = arith.addf %78, %77 : vector<32x128xf32>
    %80 = math.log %79 : vector<32x128xf32>
    %81 = arith.addf %73, %80 : vector<32x128xf32>
    %c0_41 = arith.constant 0 : index
    %c0_42 = arith.constant 0 : index
    %82 = vector.load %arg13[%c0_41, %c0_42] : memref<32x32xf32, #tpu.memory_space<vmem>>, vector<32x32xf32>
    %cst_43 = arith.constant dense<0.000000e+00> : vector<32x128xf32>
    %83 = tpu.matmul %82, %81, %cst_43 {dimension_numbers = #tpu.dot_dimension_numbers<[1], [0], [0], [1], [0, 0, 1, 1], [], []>} : vector<32x32xf32>, vector<32x128xf32>, vector<32x128xf32> -> vector<32x128xf32>
    %c0_44 = arith.constant 0 : index
    %c0_45 = arith.constant 0 : index
    %84 = vector.load %arg14[%c0_44, %c0_45] : memref<32x1xf32, #tpu.memory_space<vmem>>, vector<32x1xf32>
    %85 = vector.broadcast %84 : vector<32x1xf32> to vector<32x128xf32>
    %86 = arith.addf %83, %85 : vector<32x128xf32>
    %cst_46 = arith.constant 0.000000e+00 : f32
    %87 = vector.broadcast %cst_46 : f32 to vector<32x128xf32>
    %88 = arith.maximumf %86, %87 : vector<32x128xf32>
    %89 = math.absf %86 : vector<32x128xf32>
    %cst_47 = arith.constant 0.000000e+00 : f32
    %90 = vector.broadcast %cst_47 : f32 to vector<32x128xf32>
    %91 = arith.subf %90, %89 : vector<32x128xf32>
    %92 = math.exp %91 : vector<32x128xf32>
    %cst_48 = arith.constant 1.000000e+00 : f32
    %93 = vector.broadcast %cst_48 : f32 to vector<32x128xf32>
    %94 = arith.addf %93, %92 : vector<32x128xf32>
    %95 = math.log %94 : vector<32x128xf32>
    %96 = arith.addf %88, %95 : vector<32x128xf32>
    %97 = arith.mulf %38, %96 : vector<32x128xf32>
    %cst_49 = arith.constant dense<0.000000e+00> : vector<128xf32>
    %98 = vector.multi_reduction <add>, %97, %cst_49 [0] : vector<32x128xf32> to vector<128xf32>
    %99 = vector.shape_cast %98 : vector<128xf32> to vector<1x128xf32>
    %100 = arith.mulf %39, %96 : vector<32x128xf32>
    %cst_50 = arith.constant dense<0.000000e+00> : vector<128xf32>
    %101 = vector.multi_reduction <add>, %100, %cst_50 [0] : vector<32x128xf32> to vector<128xf32>
    %102 = vector.shape_cast %101 : vector<128xf32> to vector<1x128xf32>
    %103 = tpu.concatenate %99, %102 in 0 : vector<1x128xf32>, vector<1x128xf32> -> vector<2x128xf32>
    %c0_51 = arith.constant 0 : index
    %c0_52 = arith.constant 0 : index
    %104 = vector.load %arg15[%c0_51, %c0_52] : memref<2x128xf32, #tpu.memory_space<vmem>>, vector<2x128xf32>
    tpu.vector_store %arg15[%c0_51, %c0_52], %103 {strides = array<i32>} : memref<2x128xf32, #tpu.memory_space<vmem>>, vector<2x128xf32>,
    return
  }
  func.func @transform_0(%arg0: i32) -> (i32, i32) {
    %c0_i32 = arith.constant 0 : i32
    %c0_i32_0 = arith.constant 0 : i32
    return %c0_i32, %arg0 : i32, i32
  }
  func.func @transform_1(%arg0: i32) -> (i32, i32) {
    %c0_i32 = arith.constant 0 : i32
    %c0_i32_0 = arith.constant 0 : i32
    return %c0_i32, %arg0 : i32, i32
  }
  func.func @transform_2(%arg0: i32) -> (i32, i32) {
    %c0_i32 = arith.constant 0 : i32
    %c0_i32_0 = arith.constant 0 : i32
    %c0_i32_1 = arith.constant 0 : i32
    return %c0_i32, %c0_i32_0 : i32, i32
  }
  func.func @transform_3(%arg0: i32) -> (i32, i32) {
    %c0_i32 = arith.constant 0 : i32
    %c0_i32_0 = arith.constant 0 : i32
    %c0_i32_1 = arith.constant 0 : i32
    return %c0_i32, %c0_i32_0 : i32, i32
  }
  func.func @transform_4(%arg0: i32) -> (i32, i32, i32) {
    %c0_i32 = arith.constant 0 : i32
    %c0_i32_0 = arith.constant 0 : i32
    %c0_i32_1 = arith.constant 0 : i32
    %c0_i32_2 = arith.constant 0 : i32
    return %c0_i32, %c0_i32_0, %c0_i32_1 : i32, i32, i32
  }
  func.func @transform_5(%arg0: i32) -> (i32, i32, i32) {
    %c0_i32 = arith.constant 0 : i32
    %c0_i32_0 = arith.constant 0 : i32
    %c0_i32_1 = arith.constant 0 : i32
    %c0_i32_2 = arith.constant 0 : i32
    return %c0_i32, %c0_i32_0, %c0_i32_1 : i32, i32, i32
  }
  func.func @transform_6(%arg0: i32) -> (i32, i32) {
    %c0_i32 = arith.constant 0 : i32
    %c0_i32_0 = arith.constant 0 : i32
    %c0_i32_1 = arith.constant 0 : i32
    return %c0_i32, %c0_i32_0 : i32, i32
  }
  func.func @transform_7(%arg0: i32) -> (i32, i32) {
    %c0_i32 = arith.constant 0 : i32
    %c0_i32_0 = arith.constant 0 : i32
    %c0_i32_1 = arith.constant 0 : i32
    return %c0_i32, %c0_i32_0 : i32, i32
  }
  func.func @transform_8(%arg0: i32) -> (i32, i32) {
    %c0_i32 = arith.constant 0 : i32
    %c0_i32_0 = arith.constant 0 : i32
    %c0_i32_1 = arith.constant 0 : i32
    return %c0_i32, %c0_i32_0 : i32, i32
  }
  func.func @transform_9(%arg0: i32) -> (i32, i32) {
    %c0_i32 = arith.constant 0 : i32
    %c0_i32_0 = arith.constant 0 : i32
    %c0_i32_1 = arith.constant 0 : i32
    return %c0_i32, %c0_i32_0 : i32, i32
  }
  func.func @transform_10(%arg0: i32) -> (i32, i32) {
    %c0_i32 = arith.constant 0 : i32
    %c0_i32_0 = arith.constant 0 : i32
    %c0_i32_1 = arith.constant 0 : i32
    return %c0_i32, %c0_i32_0 : i32, i32
  }
  func.func @transform_11(%arg0: i32) -> (i32, i32) {
    %c0_i32 = arith.constant 0 : i32
    %c0_i32_0 = arith.constant 0 : i32
    %c0_i32_1 = arith.constant 0 : i32
    return %c0_i32, %c0_i32_0 : i32, i32
  }
  func.func @transform_12(%arg0: i32) -> (i32, i32) {
    %c0_i32 = arith.constant 0 : i32
    %c0_i32_0 = arith.constant 0 : i32
    %c0_i32_1 = arith.constant 0 : i32
    return %c0_i32, %c0_i32_0 : i32, i32
  }
  func.func @transform_13(%arg0: i32) -> (i32, i32) {
    %c0_i32 = arith.constant 0 : i32
    %c0_i32_0 = arith.constant 0 : i32
    %c0_i32_1 = arith.constant 0 : i32
    return %c0_i32, %c0_i32_0 : i32, i32
  }
  func.func @transform_14(%arg0: i32) -> (i32, i32) {
    %c0_i32 = arith.constant 0 : i32
    %c0_i32_0 = arith.constant 0 : i32
    return %c0_i32, %arg0 : i32, i32
  }
}

</mosaic_0001>

<bundles_post_ra>
// kernel: decoder_forward.1
= control target key start
LH: loop header
LB: loop body
LE: loop exit
PB: predicated region body
PF: predicated region fallthrough
CT: control target
= control target key end

     0   :  { %v2656_v0 = vmov 1   ;;  %v2657_v4 = vmov 0   ;;  %v72_v42 = vlaneseq  ;;  %s3905_s2 = inlined_call_operand.vmem [shape: f32[32,2], index: 2, kind: input, shape index: {}]   ;;  %s3906_s3 = inlined_call_operand.vmem [shape: f32[32,1], index: 3, kind: input, shape index: {}]   ;;  %s3907_s5 = inlined_call_operand.vmem [shape: f32[2,32,1], index: 5, kind: input, shape index: {}]   ;;  %s3908_s8 = inlined_call_operand.vmem [shape: f32[32,1], index: 8, kind: input, shape index: {}]   ;;  %s3909_s9 = inlined_call_operand.vmem [shape: f32[32,1], index: 9, kind: input, shape index: {}]   ;;  %s3910_s11 = inlined_call_operand.vmem [shape: f32[32,1], index: 11, kind: input, shape index: {}]   ;;  %s3911_s13 = inlined_call_operand.vmem [shape: f32[32,1], index: 13, kind: input, shape index: {}]   ;;  %s3912_s7 = inlined_call_operand.vmem [shape: f32[64,1], index: 7, kind: input, shape index: {}]   ;;  %s3913_s0 = inlined_call_operand.vmem [shape: f32[2,128], index: 0, kind: input, shape index: {}]   ;;  %s3914_s4 = inlined_call_operand.vmem [shape: f32[2,32,32], index: 4, kind: input, shape index: {}]   ;;  %s3915_s1 = inlined_call_operand.vmem [shape: f32[32,128], index: 1, kind: input, shape index: {}]   ;;  %s3916_s10 = inlined_call_operand.vmem [shape: f32[32,32], index: 10, kind: input, shape index: {}]   ;;  %s3917_s12 = inlined_call_operand.vmem [shape: f32[32,32], index: 12, kind: input, shape index: {}]   ;;  %s3918_s6 = inlined_call_operand.vmem [shape: f32[64,32], index: 6, kind: input, shape index: {}]   ;;  %s3919_s14 = inlined_call_operand.vmem [shape: f32[2,128], index: 14, kind: output, shape index: {}]  }
   0x1   :  { %2570 = vset.pattern.permute.xlu0 %v2656_v0  ;;  %2568 = vset.pattern.permute.xlu1 %v2656_v0  ;;  %v50_v1 = vld [vmem:[%s3905_s2 + $0x10] sm:$0xff]  ;;  %v48_v2 = vld [vmem:[%s3905_s2] sm:$0xff]  ;;  %v49_v3 = vld [vmem:[%s3905_s2 + $0x8] sm:$0xff] }
   0x2   :  { %89 = vperm.xlu0 %2570, %v50_v1   ;;  %81 = vperm.xlu1 %2568, %v48_v2   ;;  %v51_v5 = vld [vmem:[%s3905_s2 + $0x18] sm:$0xff]  ;;  %v109_v6 = vld [vmem:[%s3906_s3 + $0x8] sm:$0xff]  ;;  %v108_v7 = vld [vmem:[%s3906_s3] sm:$0xff]  ;;  %v73_v45 = vshrl.u32 %v72_v42, 7  ;;  %v2660_v42 = vmov 2131351028  }
   0x3   :  { %v556_v8 = vld [vmem:[%s3907_s5] sm:$0xff]  ;;  %v110_v9 = vld [vmem:[%s3906_s3 + $0x10] sm:$0xff]  ;;  %v111_v11 = vld [vmem:[%s3906_s3 + $0x18] sm:$0xff] }
   0x4   :  { %v558_v10 = vld [vmem:[%s3907_s5 + $0x10] sm:$0xff]  ;;  %v1861_v12 = vld [vmem:[%s3908_s8] sm:$0xff]  ;;  %v557_v13 = vld [vmem:[%s3907_s5 + $0x8] sm:$0xff]  ;;  %v74_v48 = vsub.s32 0, %v73_v45  ;;  %v98_v49 = vsub.s32 1, %v73_v45 }
   0x5   :  { %v1889_v14 = vld [vmem:[%s3909_s9] sm:$0xff]  ;;  %v559_v15 = vld [vmem:[%s3907_s5 + $0x18] sm:$0xff]  ;;  %v1863_v16 = vld [vmem:[%s3908_s8 + $0x10] sm:$0xff] }
   0x6   :  { %2571 = vset.pattern.permute.xlu0 %v2657_v4  ;;  %85 = vperm.xlu1 %2568, %v49_v3   ;;  %v1862_v17 = vld [vmem:[%s3908_s8 + $0x8] sm:$0xff]  ;;  %v1891_v18 = vld [vmem:[%s3909_s9 + $0x10] sm:$0xff]  ;;  %v2312_v20 = vld [vmem:[%s3907_s5 + $0x20] sm:$0xff] }
   0x7   :  { %54 = vperm.xlu0 %2571, %v48_v2   ;;  %v1890_v19 = vld [vmem:[%s3909_s9 + $0x8] sm:$0xff]  ;;  %v1864_v21 = vld [vmem:[%s3908_s8 + $0x18] sm:$0xff]  ;;  %v2314_v22 = vld [vmem:[%s3907_s5 + $0x30] sm:$0xff] }
   0x8   :  { %v1892_v23 = vld [vmem:[%s3909_s9 + $0x18] sm:$0xff]  ;;  %v1921_v24 = vld [vmem:[%s3910_s11] sm:$0xff]  ;;  %v2313_v25 = vld [vmem:[%s3907_s5 + $0x28] sm:$0xff] }
   0x9   :  { %v1923_v26 = vld [vmem:[%s3910_s11 + $0x10] sm:$0xff]  ;;  %v2315_v27 = vld [vmem:[%s3907_s5 + $0x38] sm:$0xff]  ;;  %v2082_v28 = vld [vmem:[%s3911_s13] sm:$0xff] }
   0xa   :  { %2569 = vset.pattern.permute.xlu1 %v2657_v4  ;;  %v1922_v29 = vld [vmem:[%s3910_s11 + $0x8] sm:$0xff]  ;;  %v2084_v30 = vld [vmem:[%s3911_s13 + $0x10] sm:$0xff]  ;;  %v1924_v31 = vld [vmem:[%s3910_s11 + $0x18] sm:$0xff] }
   0xb   :  { %59 = vperm.xlu0 %2571, %v49_v3   ;;  %69 = vperm.xlu1 %2569, %v51_v5   ;;  %v1645_v32 = vld [vmem:[%s3912_s7] sm:$0xff]  ;;  %v2083_v33 = vld [vmem:[%s3911_s13 + $0x8] sm:$0xff]  ;;  %v2085_v35 = vld [vmem:[%s3911_s13 + $0x18] sm:$0xff] }
   0xc   :  { %v1649_v34 = vld [vmem:[%s3912_s7 + $0x20] sm:$0xff]  ;;  %v1647_v36 = vld [vmem:[%s3912_s7 + $0x10] sm:$0xff]  ;;  %v1646_v37 = vld [vmem:[%s3912_s7 + $0x8] sm:$0xff] }
   0xd   :  { %v1648_v38 = vld [vmem:[%s3912_s7 + $0x18] sm:$0xff]  ;;  %v1650_v39 = vld [vmem:[%s3912_s7 + $0x28] sm:$0xff]  ;;  %v1651_v40 = vld [vmem:[%s3912_s7 + $0x30] sm:$0xff] }
   0xe   :  { %v1652_v41 = vld [vmem:[%s3912_s7 + $0x38] sm:$0xff]  ;;  %v47_v50 = vld [vmem:[%s3913_s0] sm:$0x3] }
   0xf   :  { %64 = vperm.xlu0 %2571, %v50_v1   ;;  %2572 = vset.pattern.permute.xlu1 %v2656_v0  ;;  %v75_v53 = vrot.slane %v47_v50, %v74_v48  ;;  %v99_v54 = vrot.slane %v47_v50, %v98_v49 }
  0x10   :  { %93 = vperm.xlu1 %2572, %v51_v5  }
  0x13   :  { %119 = vperm.xlu0 %2571, %v109_v6  }
  0x14   :  { %2573 = vset.pattern.permute.xlu1 %v2657_v4 }
  0x15   :  { %114 = vperm.xlu1 %2573, %v108_v7  }
  0x17   :  { %562 = vperm.xlu0 %2571, %v556_v8  }
  0x19   :  { %124 = vperm.xlu1 %2573, %v110_v9  }
  0x1b   :  { %572 = vperm.xlu0 %2571, %v558_v10  }
  0x1d   :  { %129 = vperm.xlu1 %2573, %v111_v11  }
  0x1f   :  { %1867 = vperm.xlu0 %2571, %v1861_v12  }
  0x21   :  { %567 = vperm.xlu1 %2573, %v557_v13  }
  0x23   :  { %1895 = vperm.xlu0 %2571, %v1889_v14  }
  0x25   :  { %577 = vperm.xlu1 %2573, %v559_v15  }
  0x27   :  { %1877 = vperm.xlu0 %2571, %v1863_v16  }
  0x29   :  { %1872 = vperm.xlu1 %2573, %v1862_v17  }
  0x2b   :  { %1905 = vperm.xlu0 %2571, %v1891_v18  }
  0x2d   :  { %1900 = vperm.xlu1 %2573, %v1890_v19  }
  0x2f   :  { %1106 = vperm.xlu0 %2571, %v2312_v20  }
  0x31   :  { %1882 = vperm.xlu1 %2573, %v1864_v21  }
  0x33   :  { %1116 = vperm.xlu0 %2571, %v2314_v22  }
  0x35   :  { %1910 = vperm.xlu1 %2573, %v1892_v23  }
  0x37   :  { %1927 = vperm.xlu0 %2571, %v1921_v24  }
  0x39   :  { %1111 = vperm.xlu1 %2573, %v2313_v25  }
  0x3b   :  { %1937 = vperm.xlu0 %2571, %v1923_v26  }
  0x3d   :  { %1121 = vperm.xlu1 %2573, %v2315_v27  }
  0x3f   :  { %2088 = vperm.xlu0 %2571, %v2082_v28  }
  0x41   :  { %1932 = vperm.xlu1 %2573, %v1922_v29  }
  0x43   :  { %2098 = vperm.xlu0 %2571, %v2084_v30  }
  0x45   :  { %1942 = vperm.xlu1 %2573, %v1924_v31  }
  0x47   :  { %1655 = vperm.xlu0 %2571, %v1645_v32  }
  0x49   :  { %2093 = vperm.xlu1 %2573, %v2083_v33  }
  0x4b   :  { %1675 = vperm.xlu0 %2571, %v1649_v34  }
  0x4d   :  { %2103 = vperm.xlu1 %2573, %v2085_v35  }
  0x4f   :  { %1665 = vperm.xlu0 %2571, %v1647_v36  }
  0x51   :  { %1660 = vperm.xlu1 %2573, %v1646_v37   ;;  %v2658_v37 = vmov 683565275  }
  0x53   :  { %1670 = vperm.xlu0 %2571, %v1648_v38  }
  0x55   :  { %1680 = vperm.xlu1 %2573, %v1650_v39   ;;  %v2659_v39 = vmov 2475754826  }
  0x59   :  { %1685 = vperm.xlu1 %2573, %v1651_v40  }
  0x5d   :  { %1690 = vperm.xlu1 %2573, %v1652_v41  }
  0x81   :  { %v82_v43 = vpop.permute.xlu1 %81  ;;  %v90_v44 = vpop.permute.xlu0 %89 }
  0x82   :  { %v100_v60 = vmul.f32 %v99_v54, %v82_v43  ;;  %v102_v3 = vmul.f32 %v99_v54, %v90_v44  ;;  %v2661_v44 = vmov 2102212464  }
  0x85   :  { %v86_v46 = vpop.permute.xlu1 %85 }
  0x86   :  { %v55_v47 = vpop.permute.xlu0 %54  ;;  %v101_v57 = vmul.f32 %v99_v54, %v86_v46  ;;  %v2662_v46 = vmov 920167782  }
  0x87   :  { %v76_v58 = vmul.f32 %v75_v53, %v55_v47 }
  0x89   :  { %v104_v1 = vadd.f32 %v100_v60, %v76_v58 }
  0x8a   :  { %v60_v51 = vpop.permute.xlu0 %59  ;;  %v70_v52 = vpop.permute.xlu1 %69 }
  0x8b   :  { %v77_v55 = vmul.f32 %v75_v53, %v60_v51  ;;  %v79_v18 = vmul.f32 %v75_v53, %v70_v52 }
  0x8d   :  { %v105_v61 = vadd.f32 %v101_v57, %v77_v55 }
  0x8e   :  { %v65_v56 = vpop.permute.xlu0 %64 }
  0x8f   :  { %v94_v59 = vpop.permute.xlu1 %93  ;;  %v78_v63 = vmul.f32 %v75_v53, %v65_v56  ;;  %v2663_v53 = vmov 1326507024  }
  0x90   :  { %v103_v16 = vmul.f32 %v99_v54, %v94_v59 }
  0x91   :  { %v106_v10 = vadd.f32 %v102_v3, %v78_v63 }
  0x92   :  { %v120_v62 = vpop.permute.xlu0 %119  ;;  %v107_v29 = vadd.f32 %v103_v16, %v79_v18 }
  0x93   :  { %v2862_v0 = vadd.f32 %v120_v62, %v105_v61 }
  0x94   :  { %v115_v2 = vpop.permute.xlu1 %114 }
  0x95   :  { %v240_v4 = vand.u32 2147483647, %v2862_v0  ;;  %v243_v5 = vand.u32 2139095040, %v2862_v0  ;;  %v2866_v6 = vadd.f32 %v115_v2, %v104_v1 }
  0x97   :  { %v244_v7 = vshrl.u32 %v243_v5, 23  ;;  %v247_v8 = vand.u32 8388607, %v240_v4  ;;  %v136_v9 = vand.u32 2147483647, %v2866_v6  ;;  %v139_v11 = vand.u32 2139095040, %v2866_v6 }
  0x98   :  { %v125_v12 = vpop.permute.xlu1 %124 }
  0x99   :  { %v2276_v13 = vadd.s32 4294967169, %v244_v7  ;;  %v143_v14 = vand.u32 8388607, %v136_v9  ;;  %v2874_v15 = vadd.f32 %v125_v12, %v106_v10  ;;  %v140_v17 = vshrl.u32 %v139_v11, 23 }
  0x9a   :  { %v248_v19 = vor.u32 8388608, %v247_v8 }
  0x9b   :  { %v250_v20 = vadd.s32 1, %v2276_v13  ;;  %v2272_v21 = vadd.s32 4294967169, %v140_v17  ;;  %v144_v22 = vor.u32 8388608, %v143_v14  ;;  %v344_v23 = vand.u32 2147483647, %v2874_v15 }
  0x9c   :  { %v347_v24 = vand.u32 2139095040, %v2874_v15  ;;  %v130_v25 = vpop.permute.xlu1 %129  ;;  %v2878_v32 = vshll.u32 %v248_v19, 8 }
  0x9d   :  { %vm251_vm0 = vcmp.gt.s32.totalorder %v250_v20, 0  ;;  %v146_v27 = vadd.s32 1, %v2272_v21  ;;  %v2880_v33 = vshll.u32 %v144_v22, 8  ;;  %v2884_v34 = vand.u32 8388607, %v344_v23 }
  0x9e   :  { %v252_v26 = vsel %vm251_vm0, %v250_v20, 0  ;;  %v348_v28 = vshrl.u32 %v347_v24, 23  ;;  %v2886_v35 = vadd.f32 %v130_v25, %v107_v29 }
  0x9f   :  { %v253_v30 = vshrl.u32 %v252_v26, 5  ;;  %v254_v31 = vand.u32 31, %v252_v26  ;;  %vm147_vm1 = vcmp.gt.s32.totalorder %v146_v27, 0 }
  0xa0   :  { %v2890_v41 = vadd.s32 4294967169, %v348_v28  ;;  %v148_v58 = vsel %vm147_vm1, %v146_v27, 0 }
  0xa1   :  { %v255_v36 = vsub.s32 32, %v254_v31  ;;  %v257_v38 = vshll.u32 %v2658_v37, %v254_v31  ;;  %v260_v40 = vshll.u32 %v2659_v39, %v254_v31  ;;  %v263_v43 = vshll.u32 %v2660_v42, %v254_v31 }
  0xa2   :  { %v266_v45 = vshll.u32 %v2661_v44, %v254_v31  ;;  %v269_v47 = vshll.u32 %v2662_v46, %v254_v31  ;;  %vm272_vm2 = vcmp.lt.s32.totalorder %v253_v30, 1  ;;  %vm273_vm3 = vcmp.lt.s32.totalorder %v253_v30, 2 }
  0xa3   :  { %v258_v48 = vshrl.u32 %v2659_v39, %v255_v36  ;;  %v261_v49 = vshrl.u32 %v2660_v42, %v255_v36  ;;  %v264_v50 = vshrl.u32 %v2661_v44, %v255_v36  ;;  %v256_v51 = vshrl.u32 %v2658_v37, %v255_v36 }
  0xa4   :  { %v267_v52 = vshrl.u32 %v2662_v46, %v255_v36  ;;  %v270_v54 = vshrl.u32 %v2663_v53, %v255_v36  ;;  %vm274_vm4 = vcmp.lt.s32.totalorder %v253_v30, 3  ;;  %vm275_vm5 = vcmp.lt.s32.totalorder %v253_v30, 4 }
  0xa5   :  { %v259_v55 = vor.u32 %v258_v48, %v257_v38  ;;  %v262_v56 = vor.u32 %v261_v49, %v260_v40  ;;  %v265_v57 = vor.u32 %v264_v50, %v263_v43  ;;  %v150_v61 = vand.u32 31, %v148_v58 }
  0xa6   :  { %v268_v59 = vor.u32 %v267_v52, %v266_v45  ;;  %v271_v60 = vor.u32 %v270_v54, %v269_v47  ;;  %v149_v13 = vshrl.u32 %v148_v58, 5 }
  0xa7   :  { %v276_v62 = vsel %vm272_vm2, %v256_v51, %v259_v55  ;;  %v277_v63 = vsel %vm275_vm5, %v265_v57, 2102212464  ;;  %v280_v1 = vsel %vm272_vm2, %v259_v55, %v262_v56  ;;  %v284_v2 = vsel %vm272_vm2, %v262_v56, %v265_v57 }
  0xa8   :  { %v278_v3 = vsel %vm274_vm4, %v262_v56, %v277_v63  ;;  %v281_v5 = vsel %vm275_vm5, %v268_v59, 920167782  ;;  %v285_v7 = vsel %vm275_vm5, %v271_v60, 1326507024  ;;  %v151_v8 = vsub.s32 32, %v150_v61 }
  0xa9   :  { %v279_v10 = vsel %vm273_vm3, %v276_v62, %v278_v3  ;;  %v282_v11 = vsel %vm274_vm4, %v265_v57, %v281_v5  ;;  %v286_v12 = vsel %vm274_vm4, %v268_v59, %v285_v7  ;;  %v153_v18 = vshll.u32 %v2658_v37, %v150_v61 }
  0xaa   :  { %v283_v14 = vsel %vm273_vm3, %v280_v1, %v282_v11  ;;  %v287_v16 = vsel %vm273_vm3, %v284_v2, %v286_v12  ;;  %v295_v17 = vmul.u32 %v2878_v32, %v279_v10  ;;  %v152_v24 = vshrl.u32 %v2658_v37, %v151_v8 }
  0xab   :  { %v2914_v19 = vmul.u32.u64.low %v2878_v32, %v287_v16  ;;  %v2915_v20 = vmul.u32.u64.high %v2878_v32, %v287_v16, %v2914_v19  ;;  %v2918_v21 = vmul.u32.u64.low %v2878_v32, %v283_v14  ;;  %v2919_v22 = vmul.u32.u64.high %v2878_v32, %v283_v14, %v2918_v21 }
  0xac   :  { %v154_v25 = vshrl.u32 %v2659_v39, %v151_v8  ;;  %v156_v26 = vshll.u32 %v2659_v39, %v150_v61  ;;  %v157_v27 = vshrl.u32 %v2660_v42, %v151_v8  ;;  %v159_v28 = vshll.u32 %v2660_v42, %v150_v61 }
  0xad   :  { %v160_v29 = vshrl.u32 %v2661_v44, %v151_v8  ;;  %v162_v30 = vshll.u32 %v2661_v44, %v150_v61  ;;  %v163_v31 = vshrl.u32 %v2662_v46, %v151_v8  ;;  %v165_v32 = vshll.u32 %v2662_v46, %v150_v61 }
  0xae   :  { %v155_v36 = vor.u32 %v154_v25, %v153_v18  ;;  %v158_v38 = vor.u32 %v157_v27, %v156_v26  ;;  %v166_v40 = vshrl.u32 %v2663_v53, %v151_v8  ;;  %vm297_vm6 = vc.u32 %v2915_v20, %v2918_v21 }
  0xaf   :  { %v298_v43 = vadd.s32 1, %v2919_v22  ;;  %v161_v45 = vor.u32 %v160_v29, %v159_v28  ;;  %vm168_vm7 = vcmp.lt.s32.totalorder %v149_v13, 1  ;;  %v164_v47 = vor.u32 %v163_v31, %v162_v30 }
  0xb0   :  { %v167_v48 = vor.u32 %v166_v40, %v165_v32  ;;  %vm169_vm8 = vcmp.lt.s32.totalorder %v149_v13, 2  ;;  %vm170_vm9 = vcmp.lt.s32.totalorder %v149_v13, 3  ;;  %vm171_vm10 = vcmp.lt.s32.totalorder %v149_v13, 4 }
  0xb1   :  { %v299_v49 = vsel %vm297_vm6, %v298_v43, %v2919_v22  ;;  %v172_v50 = vsel %vm168_vm7, %v152_v24, %v155_v36  ;;  %v176_v51 = vsel %vm168_vm7, %v155_v36, %v158_v38  ;;  %v173_v54 = vsel %vm171_vm10, %v161_v45, 2102212464 }
  0xb2   :  { %v300_v52 = vadd.s32 %v299_v49, %v295_v17  ;;  %v177_v55 = vsel %vm171_vm10, %v164_v47, 920167782  ;;  %v180_v56 = vsel %vm168_vm7, %v158_v38, %v161_v45  ;;  %v174_v57 = vsel %vm170_vm9, %v158_v38, %v173_v54 }
  0xb3   :  { %v178_v58 = vsel %vm170_vm9, %v161_v45, %v177_v55  ;;  %v181_v59 = vsel %vm171_vm10, %v167_v48, 1326507024  ;;  %v354_v60 = vadd.s32 1, %v2890_v41  ;;  %v352_v1 = vor.u32 8388608, %v2884_v34 }
  0xb4   :  { %v301_v61 = vadd.s32 536870912, %v300_v52  ;;  %v179_v62 = vsel %vm169_vm8, %v176_v51, %v178_v58  ;;  %v182_v63 = vsel %vm170_vm9, %v164_v47, %v181_v59  ;;  %v175_v2 = vsel %vm169_vm8, %v172_v50, %v174_v57 }
  0xb5   :  { %v183_v3 = vsel %vm169_vm8, %v180_v56, %v182_v63  ;;  %v2940_v5 = vmul.u32.u64.low %v2880_v33, %v179_v62  ;;  %v2941_v7 = vmul.u32.u64.high %v2880_v33, %v179_v62, %v2940_v5  ;;  %vm355_vm11 = vcmp.gt.s32.totalorder %v354_v60, 0 }
  0xb6   :  { %v2944_v8 = vshrl.u32 %v301_v61, 30  ;;  %v2947_v10 = vmul.u32.u64.low %v2880_v33, %v183_v3  ;;  %v2948_v41 = vmul.u32.u64.high %v2880_v33, %v183_v3, %v2947_v10  ;;  %v356_v11 = vsel %vm355_vm11, %v354_v60, 0 }
  0xb7   :  { %v358_v34 = vand.u32 31, %v356_v11  ;;  %v448_v14 = vand.u32 2147483647, %v2886_v35  ;;  %v296_v13 = vadd.s32 %v2918_v21, %v2915_v20  ;;  %v191_v16 = vmul.u32 %v2880_v33, %v175_v2 }
  0xb8   :  { %v303_v12 = vshll.u32 %v2944_v8, 30  ;;  %v194_v17 = vadd.s32 1, %v2941_v7  ;;  %v2955_v18 = vshll.u32 %v352_v1, 8  ;;  %vm193_vm12 = vc.u32 %v2948_v41, %v2940_v5 }
  0xb9   :  { %v359_v22 = vsub.s32 32, %v358_v34  ;;  %v451_v24 = vand.u32 2139095040, %v2886_v35  ;;  %v357_v26 = vshrl.u32 %v356_v11, 5  ;;  %v361_v27 = vshll.u32 %v2658_v37, %v358_v34 }
  0xba   :  { %v2957_v19 = vsub.s32 %v300_v52, %v303_v12  ;;  %v195_v25 = vsel %vm193_vm12, %v194_v17, %v2941_v7  ;;  %v364_v20 = vshll.u32 %v2659_v39, %v358_v34  ;;  %v367_v29 = vshll.u32 %v2660_v42, %v358_v34 }
  0xbb   :  { %v196_v21 = vadd.s32 %v195_v25, %v191_v16  ;;  %v362_v28 = vshrl.u32 %v2659_v39, %v359_v22  ;;  %v365_v30 = vshrl.u32 %v2660_v42, %v359_v22  ;;  %v368_v31 = vshrl.u32 %v2661_v44, %v359_v22 }
  0xbc   :  { %v306_v33 = vsub.s32 0, %v2957_v19  ;;  %v370_v36 = vshll.u32 %v2661_v44, %v358_v34  ;;  %v371_v38 = vshrl.u32 %v2662_v46, %v359_v22  ;;  %v373_v45 = vshll.u32 %v2662_v46, %v358_v34 }
  0xbd   :  { %v197_v40 = vadd.s32 536870912, %v196_v21  ;;  %v363_v43 = vor.u32 %v362_v28, %v361_v27  ;;  %v366_v47 = vor.u32 %v365_v30, %v364_v20  ;;  %v369_v48 = vor.u32 %v368_v31, %v367_v29 }
  0xbe   :  { %v2277_v32 = vmin.u32 %v306_v33, %v2957_v19  ;;  %v372_v49 = vor.u32 %v371_v38, %v370_v36  ;;  %v374_v50 = vshrl.u32 %v2663_v53, %v359_v22  ;;  %v452_v54 = vshrl.u32 %v451_v24, 23 }
  0xbf   :  { %v2975_v52 = vshrl.u32 %v197_v40, 30  ;;  %v455_v55 = vand.u32 8388607, %v448_v14  ;;  %vm376_vm13 = vcmp.lt.s32.totalorder %v357_v26, 1  ;;  %vm377_vm14 = vcmp.lt.s32.totalorder %v357_v26, 2 }
  0xc0   :  { %v308_v51 = vclz %v2277_v32  ;;  %v375_v56 = vor.u32 %v374_v50, %v373_v45  ;;  %vm378_vm15 = vcmp.lt.s32.totalorder %v357_v26, 3  ;;  %vm379_vm0 = vcmp.lt.s32.totalorder %v357_v26, 4 }
  0xc1   :  { %v199_v58 = vshll.u32 %v2975_v52, 30  ;;  %v384_v59 = vsel %vm376_vm13, %v363_v43, %v366_v47  ;;  %v360_v60 = vshrl.u32 %v2658_v37, %v359_v22  ;;  %v381_v61 = vsel %vm379_vm0, %v369_v48, 2102212464 }
  0xc2   :  { %v2278_v57 = vadd.s32 4294967294, %v308_v51  ;;  %v385_v62 = vsel %vm379_vm0, %v372_v49, 920167782  ;;  %v389_v63 = vsel %vm379_vm0, %v375_v56, 1326507024  ;;  %v388_v3 = vsel %vm376_vm13, %v366_v47, %v369_v48 }
  0xc3   :  { %v200_v1 = vsub.s32 %v196_v21, %v199_v58  ;;  %v386_v2 = vsel %vm378_vm15, %v369_v48, %v385_v62  ;;  %v380_v10 = vsel %vm376_vm13, %v360_v60, %v363_v43  ;;  %v390_v12 = vsel %vm378_vm15, %v372_v49, %v389_v63 }
  0xc4   :  { %vm2279_vm1 = vcmp.lt.s32.totalorder %v2278_v57, 0  ;;  %v387_v11 = vsel %vm377_vm14, %v384_v59, %v386_v2  ;;  %v382_v22 = vsel %vm378_vm15, %v366_v47, %v381_v61  ;;  %v391_v24 = vsel %vm377_vm14, %v388_v3, %v390_v12 }
  0xc5   :  { %v311_v7 = vsel %vm2279_vm1, 0, %v2278_v57  ;;  %v202_v17 = vsub.s32 0, %v200_v1  ;;  %v2990_v25 = vmul.u32.u64.low %v2955_v18, %v387_v11  ;;  %v2991_v27 = vmul.u32.u64.high %v2955_v18, %v387_v11, %v2990_v25 }
  0xc6   :  { %v312_v34 = vsub.s32 32, %v311_v7  ;;  %v316_v16 = vsub.s32 4294967266, %v311_v7  ;;  %v2284_v20 = vadd.s32 4294967169, %v452_v54  ;;  %v313_v33 = vshll.u32 %v2957_v19, %v311_v7 }
  0xc7   :  { %v2273_v29 = vmin.u32 %v202_v17, %v200_v1  ;;  %v2996_v30 = vmul.u32.u64.low %v2955_v18, %v391_v24  ;;  %v2997_v31 = vmul.u32.u64.high %v2955_v18, %v391_v24, %v2996_v30  ;;  %v383_v43 = vsel %vm377_vm14, %v380_v10, %v382_v22 }
  0xc8   :  { %v314_v21 = vshrl.u32 %v296_v13, %v312_v34  ;;  %v317_v28 = vadd.s32 127, %v316_v16  ;;  %v458_v36 = vadd.s32 1, %v2284_v20  ;;  %v402_v45 = vadd.s32 1, %v2991_v27 }
  0xc9   :  { %v204_v40 = vclz %v2273_v29  ;;  %v456_v47 = vor.u32 8388608, %v455_v55  ;;  %v192_v13 = vadd.s32 %v2940_v5, %v2948_v41  ;;  %v399_v50 = vmul.u32 %v2955_v18, %v383_v43 }
  0xca   :  { %v315_v38 = vor.u32 %v314_v21, %v313_v33  ;;  %v318_v32 = vshll.u32 %v317_v28, 23  ;;  %vm459_vm2 = vcmp.gt.s32.totalorder %v458_v36, 0  ;;  %vm401_vm3 = vc.u32 %v2997_v31, %v2990_v25 }
  0xcb   :  { %v2274_v49 = vadd.s32 4294967294, %v204_v40  ;;  %v460_v19 = vsel %vm459_vm2, %v458_v36, 0  ;;  %vm242_vm4 = vcmp.lt.s32.totalorder %v2862_v0, 0  ;;  %v403_v55 = vsel %vm401_vm3, %v402_v45, %v2991_v27 }
  0xcc   :  { %v319_v48 = vor.u32 4788187, %v318_v32  ;;  %v462_v51 = vand.u32 31, %v460_v19  ;;  %v322_v54 = vcvt.s32.f32 %v315_v38  ;;  %v404_v57 = vadd.s32 %v403_v55, %v399_v50 }
  0xcd   :  { %vm2275_vm5 = vcmp.lt.s32.totalorder %v2274_v49, 0  ;;  %v3008_v59 = vshll.u32 %v456_v47, 8  ;;  %v461_v18 = vshrl.u32 %v460_v19, 5  ;;  %vm138_vm6 = vcmp.lt.s32.totalorder %v2866_v6, 0 }
  0xce   :  { %v320_v26 = vand.u32 2147483647, %v319_v48  ;;  %v207_v56 = vsel %vm2275_vm5, 0, %v2274_v49  ;;  %v463_v58 = vsub.s32 32, %v462_v51  ;;  %v405_v62 = vadd.s32 536870912, %v404_v57 }
  0xcf   :  { %v208_v5 = vsub.s32 32, %v207_v56  ;;  %v212_v41 = vsub.s32 4294967266, %v207_v56  ;;  %v209_v61 = vshll.u32 %v200_v1, %v207_v56  ;;  %v465_v63 = vshll.u32 %v2658_v37, %v462_v51 }
  0xd0   :  { %v323_v60 = vmul.f32 %v322_v54, %v320_v26  ;;  %v466_v2 = vshrl.u32 %v2659_v39, %v463_v58  ;;  %v468_v10 = vshll.u32 %v2659_v39, %v462_v51  ;;  %v469_v11 = vshrl.u32 %v2660_v42, %v463_v58 }
  0xd1   :  { %v210_v3 = vshrl.u32 %v192_v13, %v208_v5  ;;  %v213_v7 = vadd.s32 127, %v212_v41  ;;  %v3014_v34 = vshrl.u32 %v405_v62, 30  ;;  %v471_v16 = vshll.u32 %v2660_v42, %v462_v51 }
  0xd2   :  { %v324_v12 = vxor.u32 2147483648, %v323_v60  ;;  %v472_v17 = vshrl.u32 %v2661_v44, %v463_v58  ;;  %v467_v24 = vor.u32 %v466_v2, %v465_v63  ;;  %v470_v27 = vor.u32 %v469_v11, %v468_v10 }
  0xd3   :  { %v211_v22 = vor.u32 %v210_v3, %v209_v61  ;;  %v214_v1 = vshll.u32 %v213_v7, 23  ;;  %v407_v20 = vshll.u32 %v3014_v34, 30  ;;  %v474_v21 = vshll.u32 %v2661_v44, %v462_v51 }
  0xd4   :  { %v473_v33 = vor.u32 %v472_v17, %v471_v16  ;;  %v475_v28 = vshrl.u32 %v2662_v46, %v463_v58  ;;  %v464_v30 = vshrl.u32 %v2658_v37, %v463_v58  ;;  %v477_v36 = vshll.u32 %v2662_v46, %v462_v51 }
  0xd5   :  { %v215_v29 = vor.u32 4788187, %v214_v1  ;;  %v478_v38 = vshrl.u32 %v2663_v53, %v463_v58  ;;  %v325_v32 = vsel %vm242_vm4, %v324_v12, %v323_v60  ;;  %v218_v40 = vcvt.s32.f32 %v211_v22 }
  0xd6   :  { %v3027_v43 = vsub.s32 %v404_v57, %v407_v20  ;;  %v476_v45 = vor.u32 %v475_v28, %v474_v21  ;;  %vm3031_vm7 = vcmp.le.f32.partialorder %v240_v4, 0.7853982  ;;  %vm480_vm8 = vcmp.lt.s32.totalorder %v461_v18, 1 }
  0xd7   :  { %v216_v48 = vand.u32 2147483647, %v215_v29  ;;  %v479_v49 = vor.u32 %v478_v38, %v477_v36  ;;  %vm483_vm9 = vcmp.lt.s32.totalorder %v461_v18, 4  ;;  %vm481_vm10 = vcmp.lt.s32.totalorder %v461_v18, 2 }
  0xd8   :  { %v410_v19 = vsub.s32 0, %v3027_v43  ;;  %v485_v13 = vsel %vm483_vm9, %v473_v33, 2102212464  ;;  %v488_v50 = vsel %vm480_vm8, %v467_v24, %v470_v27  ;;  %vm482_vm11 = vcmp.lt.s32.totalorder %v461_v18, 3 }
  0xd9   :  { %v219_v51 = vmul.f32 %v218_v40, %v216_v48  ;;  %v489_v26 = vsel %vm483_vm9, %v476_v45, 920167782  ;;  %v492_v54 = vsel %vm480_vm8, %v470_v27, %v473_v33  ;;  %v484_v56 = vsel %vm480_vm8, %v464_v30, %v467_v24 }
  0xda   :  { %v2281_v55 = vmin.u32 %v410_v19, %v3027_v43  ;;  %v490_v4 = vsel %vm482_vm11, %v473_v33, %v489_v26  ;;  %v493_v57 = vsel %vm483_vm9, %v479_v49, 1326507024  ;;  %v486_v60 = vsel %vm482_vm11, %v470_v27, %v485_v13 }
  0xdb   :  { %v220_v58 = vxor.u32 2147483648, %v219_v51  ;;  %v491_v5 = vsel %vm481_vm10, %v488_v50, %v490_v4  ;;  %v494_v41 = vsel %vm482_vm11, %v476_v45, %v493_v57  ;;  %vm3052_vm12 = vcmp.le.f32.partialorder %v136_v9, 0.7853982 }
  0xdc   :  { %v412_v61 = vclz %v2281_v55  ;;  %v495_v62 = vsel %vm481_vm10, %v492_v54, %v494_v41  ;;  %v3040_v63 = vmul.u32.u64.low %v3008_v59, %v491_v5  ;;  %v3041_v2 = vmul.u32.u64.high %v3008_v59, %v491_v5, %v3040_v63 }
  0xdd   :  { %v221_v3 = vsel %vm138_vm6, %v220_v58, %v219_v51  ;;  %v3047_v7 = vmul.u32.u64.low %v3008_v59, %v495_v62  ;;  %v3048_v10 = vmul.u32.u64.high %v3008_v59, %v495_v62, %v3047_v7  ;;  %v487_v16 = vsel %vm481_vm10, %v484_v56, %v486_v60 }
  0xde   :  { %v2282_v12 = vadd.s32 4294967294, %v412_v61  ;;  %v222_v17 = vsub.s32 4, %v2975_v52  ;;  %v224_v22 = vsel %vm3052_vm12, %v2866_v6, %v221_v3  ;;  %v326_v1 = vsub.s32 4, %v2944_v8 }
  0xdf   :  { %2574 = vcosq.f32 %v224_v22  ;;  %v328_v24 = vsel %vm3031_vm7, %v2862_v0, %v325_v32  ;;  %v506_v9 = vadd.s32 1, %v3041_v2  ;;  %v503_v20 = vmul.u32 %v3008_v59, %v487_v16 }
  0xe0   :  { %vm2283_vm13 = vcmp.lt.s32.totalorder %v2282_v12, 0  ;;  %v223_v18 = vsel %vm138_vm6, %v222_v17, %v2975_v52  ;;  %2576 = vsinq.f32 %v224_v22  ;;  %vm505_vm14 = vc.u32 %v3048_v10, %v3040_v63 }
  0xe1   :  { %v415_v27 = vsel %vm2283_vm13, 0, %v2282_v12  ;;  %v507_v28 = vsel %vm505_vm14, %v506_v9, %v3041_v2  ;;  %v225_v30 = vsel %vm3052_vm12, 0, %v223_v18  ;;  %v327_v36 = vsel %vm242_vm4, %v326_v1, %v2944_v8 }
  0xe2   :  { %v416_v33 = vsub.s32 32, %v415_v27  ;;  %v420_v21 = vsub.s32 4294967266, %v415_v27  ;;  %v508_v29 = vadd.s32 %v507_v28, %v503_v20  ;;  %2578 = vcosq.f32 %v328_v24 }
  0xe3   :  { %v400_v52 = vadd.s32 %v2990_v25, %v2997_v31  ;;  %v229_v38 = vadd.s32 3, %v225_v30  ;;  %v329_v32 = vsel %vm3031_vm7, 0, %v327_v36  ;;  %2580 = vsinq.f32 %v328_v24  ;;  %v552_v25 = vld [vmem:[%s3914_s4] sm:$0xff] }
  0xe4   :  { %v421_v59 = vadd.s32 127, %v420_v21  ;;  %v509_v40 = vadd.s32 536870912, %v508_v29  ;;  %v333_v49 = vadd.s32 3, %v329_v32  ;;  %v417_v50 = vshll.u32 %v3027_v43, %v415_v27 }
  0xe5   :  { %v418_v45 = vshrl.u32 %v400_v52, %v416_v33  ;;  %v230_v13 = vand.u32 3, %v229_v38  ;;  %vm580_vm0 = vcmask 261120   ;;  %vm228_vm4 = vweird.f32 %v2866_v6 }
  0xe6   :  { %v422_v48 = vshll.u32 %v421_v59, 23  ;;  %v3082_v19 = vshrl.u32 %v509_v40, 30  ;;  %v334_v55 = vand.u32 3, %v333_v49  ;;  %2404 = vmatprep.mubr.msk.f32.mxu0 %vm580_vm0, %v552_v25  ;;  %vm332_vm7 = vweird.f32 %v2862_v0 }
  0xe7   :  { %v419_v47 = vor.u32 %v418_v45, %v417_v50  ;;  %vm235_vm15 = vcmp.eq.s32.totalorder %v230_v13, 2  ;;  %vm232_vm1 = vcmp.eq.s32.totalorder %v230_v13, 0  ;;  %vm231_vm2 = vcmp.lt.s32.totalorder %v230_v13, 2 }
  0xe8   :  { %v423_v51 = vor.u32 4788187, %v422_v48  ;;  %v511_v26 = vshll.u32 %v3082_v19, 30  ;;  %vm339_vm3 = vcmp.eq.s32.totalorder %v334_v55, 2  ;;  %vm336_vm5 = vcmp.eq.s32.totalorder %v334_v55, 0 }
  0xe9   :  { %v2575_v8 = vpop.eup %2574  ;;  %v426_v62 = vcvt.s32.f32 %v419_v47  ;;  %vm335_vm6 = vcmp.lt.s32.totalorder %v334_v55, 2  ;;  %v504_v33 = vadd.s32 %v3040_v63, %v3048_v10  ;;  %vm346_vm9 = vcmp.lt.s32.totalorder %v2874_v15, 0 }
  0xea   :  { %v2577_v31 = vpop.eup %2576  ;;  %v236_v54 = vxor.u32 2147483648, %v2575_v8  ;;  %v512_v56 = vsub.s32 %v508_v29, %v511_v26  ;;  %v424_v58 = vand.u32 2147483647, %v423_v51  ;;  %vm3099_vm10 = vcmp.le.f32.partialorder %v344_v23, 0.7853982 }
  0xeb   :  { %v233_v4 = vxor.u32 2147483648, %v2577_v31  ;;  %v430_v38 = vsub.s32 4, %v3014_v34  ;;  %v534_v48 = vsub.s32 4, %v3082_v19  ;;  %vm450_vm11 = vcmp.lt.s32.totalorder %v2886_v35, 0 }
  0xec   :  { %v237_v57 = vsel %vm235_vm15, %v236_v54, %v2577_v31  ;;  %v2579_v43 = vpop.eup %2578  ;;  %v514_v60 = vsub.s32 0, %v512_v56  ;;  %v427_v12 = vmul.f32 %v426_v62, %v424_v58  ;;  %vm449_vm12 = vcmp.le.f32.partialorder %v448_v14, 0.7853982 }
  0xed   :  { %v234_v5 = vsel %vm232_vm1, %v2575_v8, %v233_v4  ;;  %v340_v41 = vxor.u32 2147483648, %v2579_v43  ;;  %v2581_v61 = vpop.eup %2580  ;;  %v431_v23 = vsel %vm346_vm9, %v430_v38, %v3014_v34  ;;  %v535_v8 = vsel %vm450_vm11, %v534_v48, %v3082_v19 }
  0xee   :  { %v2285_v2 = vmin.u32 %v514_v60, %v512_v56  ;;  %v238_v3 = vsel %vm231_vm2, %v234_v5, %v237_v57  ;;  %v337_v7 = vxor.u32 2147483648, %v2581_v61  ;;  %v428_v18 = vxor.u32 2147483648, %v427_v12 }
  0xef   :  { %v341_v11 = vsel %vm339_vm3, %v340_v41, %v2581_v61  ;;  %v239_v17 = vsel %vm228_vm4, nan, %v238_v3  ;;  %v433_v50 = vsel %vm3099_vm10, 0, %v431_v23  ;;  %v537_v25 = vsel %vm449_vm12, 0, %v535_v8 }
  0xf0   :  { %v516_v16 = vclz %v2285_v2  ;;  %v338_v22 = vsel %vm336_vm5, %v2579_v43, %v337_v7  ;;  %v429_v6 = vsel %vm346_vm9, %v428_v18, %v427_v12  ;;  %v437_v26 = vadd.s32 3, %v433_v50  ;;  %v554_v12 = vld [vmem:[%s3914_s4 + $0x10] sm:$0xff] }
  0xf1   :  { %v342_v24 = vsel %vm335_vm6, %v338_v22, %v341_v11  ;;  %v432_v10 = vsel %vm3099_vm10, %v2874_v15, %v429_v6  ;;  %v541_v47 = vadd.s32 3, %v537_v25  ;;  %vm436_vm4 = vweird.f32 %v2874_v15  ;;  %v553_v11 = vld [vmem:[%s3914_s4 + $0x8] sm:$0xff]  ;;  %v555_v15 = vld [vmem:[%s3914_s4 + $0x18] sm:$0xff]  ;;  %v1824_v22 = vld [vmem:[%s3915_s1 + $0x10] sm:$0xff] }
  0xf2   :  { %v2286_v1 = vadd.s32 4294967294, %v516_v16  ;;  %v343_v9 = vsel %vm332_vm7, nan, %v342_v24  ;;  %2582 = vcosq.f32 %v432_v10  ;;  %v438_v54 = vand.u32 3, %v437_v26  ;;  %v1823_v16 = vld [vmem:[%s3915_s1 + $0x8] sm:$0xff]  ;;  %v1825_v24 = vld [vmem:[%s3915_s1 + $0x18] sm:$0xff] }
  0xf3   :  { %v2472_v27 = vpack.c.bf16 %v343_v9, %v239_v17  ;;  %2584 = vsinq.f32 %v432_v10  ;;  %v542_v4 = vand.u32 3, %v541_v47  ;;  %vm540_vm5 = vweird.f32 %v2886_v35 }
  0xf4   :  { %vm2287_vm8 = vcmp.lt.s32.totalorder %v2286_v1, 0  ;;  %vm440_vm13 = vcmp.eq.s32.totalorder %v438_v54, 0  ;;  %vm443_vm14 = vcmp.eq.s32.totalorder %v438_v54, 2  ;;  %vm439_vm15 = vcmp.lt.s32.totalorder %v438_v54, 2 }
  0xf5   :  { %v519_v20 = vsel %vm2287_vm8, 0, %v2286_v1  ;;  %2473 = vmatprep.subr.bf16.mxu0 %v2472_v27  ;;  %vm547_vm1 = vcmp.eq.s32.totalorder %v542_v4, 2  ;;  %vm544_vm2 = vcmp.eq.s32.totalorder %v542_v4, 0  ;;  %vm543_vm3 = vcmp.lt.s32.totalorder %v542_v4, 2 }
  0xf6   :  { %v520_v21 = vsub.s32 32, %v519_v20  ;;  %v524_v28 = vsub.s32 4294967266, %v519_v20  ;;  %2475 = vmatpush3.bf16.msra.mxu0 %v2472_v27  ;;  %v521_v29 = vshll.u32 %v512_v56, %v519_v20 }
  0xf8   :  { %v522_v0 = vshrl.u32 %v504_v33, %v520_v21  ;;  %v525_v30 = vadd.s32 127, %v524_v28 }
  0xfa   :  { %v523_v52 = vor.u32 %v522_v0, %v521_v29  ;;  %v526_v63 = vshll.u32 %v525_v30, 23  ;;  %v568_v29 = vpop.permute.xlu1 %567  ;;  %v563_v0 = vpop.permute.xlu0 %562 }
  0xfc   :  { %v527_v59 = vor.u32 4788187, %v526_v63  ;;  %v530_v40 = vcvt.s32.f32 %v523_v52  ;;  %v2583_v31 = vpop.eup %2582 }
  0xfd   :  { %v2585_v34 = vpop.eup %2584  ;;  %v444_v56 = vxor.u32 2147483648, %v2583_v31 }
  0xfe   :  { %v528_v32 = vand.u32 2147483647, %v527_v59  ;;  %v441_v55 = vxor.u32 2147483648, %v2585_v34 }
  0xff   :  { %v445_v43 = vsel %vm443_vm14, %v444_v56, %v2585_v34 }
 0x100   :  { %v531_v45 = vmul.f32 %v530_v40, %v528_v32  ;;  %v442_v57 = vsel %vm440_vm13, %v2583_v31, %v441_v55  ;;  %v578_v40 = vpop.permute.xlu1 %577 }
 0x101   :  { %v446_v5 = vsel %vm439_vm15, %v442_v57, %v445_v43 }
 0x102   :  { %v532_v49 = vxor.u32 2147483648, %v531_v45  ;;  %v447_v2 = vsel %vm436_vm4, nan, %v446_v5 }
 0x104   :  { %v533_v13 = vsel %vm450_vm11, %v532_v49, %v531_v45 }
 0x105   :  { %v536_v51 = vsel %vm449_vm12, %v2886_v35, %v533_v13  ;;  %v1822_v35 = vld [vmem:[%s3915_s1] sm:$0xff] }
 0x106   :  { %2586 = vcosq.f32 %v536_v51  ;;  %v1826_v17 = vadd.f32 %v1823_v16, %v1822_v35 }
 0x107   :  { %2588 = vsinq.f32 %v536_v51  ;;  %v573_v51 = vpop.permute.xlu0 %572 }
 0x108   :  { %v1827_v1 = vadd.f32 %v1826_v17, %v1824_v22 }
 0x10a   :  { %v1828_v9 = vadd.f32 %v1827_v1, %v1825_v24 }
 0x10c   :  { %v1829_v18 = vrot.slane %v1828_v9, 4 }
 0x10e   :  { %v1830_v27 = vadd.f32 %v1829_v18, %v1828_v9 }
 0x110   :  { %v2587_v14 = vpop.eup %2586  ;;  %v1831_v20 = vrot.slane %v1830_v27, 2 }
 0x111   :  { %v2589_v58 = vpop.eup %2588  ;;  %v548_v19 = vxor.u32 2147483648, %v2587_v14 }
 0x112   :  { %v545_v60 = vxor.u32 2147483648, %v2589_v58  ;;  %v1832_v33 = vadd.f32 %v1831_v20, %v1830_v27 }
 0x113   :  { %v549_v41 = vsel %vm547_vm1, %v548_v19, %v2589_v58 }
 0x114   :  { %v546_v61 = vsel %vm544_vm2, %v2587_v14, %v545_v60  ;;  %v1833_v21 = vrot.slane %v1832_v33, 1 }
 0x115   :  { %v550_v62 = vsel %vm543_vm3, %v546_v61, %v549_v41  ;;  %v2308_v61 = vld [vmem:[%s3914_s4 + $0x20] sm:$0xff] }
 0x116   :  { %v551_v3 = vsel %vm540_vm5, nan, %v550_v62  ;;  %v1834_v28 = vadd.f32 %v1833_v21, %v1832_v33  ;;  %2418 = vmatprep.mubr.msk.f32.mxu1 %vm580_vm0, %v2308_v61 }
 0x117   :  { %v2476_v7 = vpack.c.bf16 %v551_v3, %v447_v2 }
 0x118   :  { %v1836_v6 = vmul.f32 0.03125, %v1834_v28 }
 0x119   :  { %2477 = vmatprep.subr.bf16.mxu0 %v2476_v7 }
 0x11a   :  { %2479 = vmatpush3.bf16.msra.mxu0 %v2476_v7  ;;  %v3146_v63 = vsub.f32 %v1822_v35, %v1836_v6  ;;  %v3150_v59 = vsub.f32 %v1823_v16, %v1836_v6  ;;  %v3160_v26 = vsub.f32 %v1824_v22, %v1836_v6  ;;  %v3172_v19 = vsub.f32 %v1825_v24, %v1836_v6 }
 0x11c   :  { %v1841_v25 = vmul.f32 %v3146_v63, %v3146_v63  ;;  %v1842_v47 = vmul.f32 %v3150_v59, %v3150_v59  ;;  %v3183_v62 = vmul.f32 %v3160_v26, %v3160_v26 }
 0x11d   :  { %2405 = vmatmul.mubr.msk.f32.vlgmr.msra.gmra.mrb[0].mxu0 %vm580_vm0, %v553_v11 }
 0x11e   :  { %2407 = vmatprep.mubr.msk.f32.mxu0 %vm580_vm0, %v554_v12  ;;  %v3185_v2 = vadd.f32 %v1842_v47, %v1841_v25 }
 0x121   :  { %2408 = vmatmul.mubr.msk.f32.gmra.mrb[2].mxu0 %vm580_vm0, %v555_v15 }
 0x1f0   :  { %v2406_v30 = vpop.f32.mrb[0].mxu0 }
 0x1f1   :  { %v3144_v36 = vadd.f32 %v2406_v30, %v568_v29  ;;  %v659_v52 = vpop.f32.mrb[1].mxu0 }
 0x1f2   :  { %v3148_v10 = vadd.f32 %v659_v52, %v563_v0 }
 0x1f3   :  { %v782_v38 = vand.u32 2147483647, %v3144_v36  ;;  %v785_v32 = vand.u32 2139095040, %v3144_v36 }
 0x1f4   :  { %v678_v45 = vand.u32 2147483647, %v3148_v10  ;;  %v681_v48 = vand.u32 2139095040, %v3148_v10  ;;  %v2409_v23 = vpop.f32.mrb[2].mxu0 }
 0x1f5   :  { %v786_v49 = vshrl.u32 %v785_v32, 23  ;;  %v789_v13 = vand.u32 8388607, %v782_v38  ;;  %v3158_v50 = vadd.f32 %v2409_v23, %v578_v40  ;;  %v669_v8 = vpop.f32.mrb[3].mxu0 }
 0x1f6   :  { %v682_v31 = vshrl.u32 %v681_v48, 23  ;;  %v685_v34 = vand.u32 8388607, %v678_v45  ;;  %v3169_v56 = vadd.f32 %v669_v8, %v573_v51 }
 0x1f7   :  { %v2296_v54 = vadd.s32 4294967169, %v786_v49  ;;  %v990_v55 = vand.u32 2147483647, %v3158_v50  ;;  %v790_v4 = vor.u32 8388608, %v789_v13  ;;  %v993_v57 = vand.u32 2139095040, %v3158_v50 }
 0x1f8   :  { %v2292_v14 = vadd.s32 4294967169, %v682_v31  ;;  %v686_v58 = vor.u32 8388608, %v685_v34  ;;  %v886_v3 = vand.u32 2147483647, %v3169_v56  ;;  %v889_v9 = vand.u32 2139095040, %v3169_v56 }
 0x1f9   :  { %v792_v43 = vadd.s32 1, %v2296_v54  ;;  %v994_v5 = vshrl.u32 %v993_v57, 23  ;;  %v3176_v41 = vand.u32 8388607, %v990_v55  ;;  %v3189_v11 = vshll.u32 %v790_v4, 8 }
 0x1fa   :  { %v688_v60 = vadd.s32 1, %v2292_v14  ;;  %v3191_v17 = vshll.u32 %v686_v58, 8 }
 0x1fb   :  { %vm793_vm6 = vcmp.gt.s32.totalorder %v792_v43, 0  ;;  %v2304_v12 = vadd.s32 4294967169, %v994_v5  ;;  %v998_v24 = vor.u32 8388608, %v3176_v41 }
 0x1fc   :  { %v794_v7 = vsel %vm793_vm6, %v792_v43, 0  ;;  %vm689_vm7 = vcmp.gt.s32.totalorder %v688_v60, 0 }
 0x1fd   :  { %v795_v15 = vshrl.u32 %v794_v7, 5  ;;  %v796_v35 = vand.u32 31, %v794_v7  ;;  %v690_v16 = vsel %vm689_vm7, %v688_v60, 0  ;;  %v3199_v33 = vadd.s32 1, %v2304_v12 }
 0x1fe   :  { %v3193_v22 = vshrl.u32 %v690_v16, 5  ;;  %v692_v1 = vand.u32 31, %v690_v16 }
 0x1ff   :  { %v797_v18 = vsub.s32 32, %v796_v35  ;;  %v799_v27 = vshll.u32 %v2658_v37, %v796_v35  ;;  %v802_v20 = vshll.u32 %v2659_v39, %v796_v35  ;;  %v805_v21 = vshll.u32 %v2660_v42, %v796_v35 }
 0x200   :  { %v808_v28 = vshll.u32 %v2661_v44, %v796_v35  ;;  %v811_v6 = vshll.u32 %v2662_v46, %v796_v35  ;;  %vm814_vm8 = vcmp.lt.s32.totalorder %v795_v15, 1  ;;  %vm815_vm9 = vcmp.lt.s32.totalorder %v795_v15, 2 }
 0x201   :  { %v800_v29 = vshrl.u32 %v2659_v39, %v797_v18  ;;  %v803_v0 = vshrl.u32 %v2660_v42, %v797_v18  ;;  %v806_v30 = vshrl.u32 %v2661_v44, %v797_v18  ;;  %v798_v52 = vshrl.u32 %v2658_v37, %v797_v18 }
 0x202   :  { %v809_v32 = vshrl.u32 %v2662_v46, %v797_v18  ;;  %v812_v40 = vshrl.u32 %v2663_v53, %v797_v18  ;;  %vm816_vm10 = vcmp.lt.s32.totalorder %v795_v15, 3  ;;  %v693_v13 = vsub.s32 32, %v692_v1 }
 0x203   :  { %v801_v48 = vor.u32 %v800_v29, %v799_v27  ;;  %v804_v23 = vor.u32 %v803_v0, %v802_v20  ;;  %v807_v49 = vor.u32 %v806_v30, %v805_v21  ;;  %vm817_vm11 = vcmp.lt.s32.totalorder %v795_v15, 4 }
 0x204   :  { %v810_v8 = vor.u32 %v809_v32, %v808_v28  ;;  %v813_v51 = vor.u32 %v812_v40, %v811_v6  ;;  %v695_v25 = vshll.u32 %v2658_v37, %v692_v1  ;;  %v698_v43 = vshll.u32 %v2659_v39, %v692_v1 }
 0x205   :  { %v818_v31 = vsel %vm814_vm8, %v798_v52, %v801_v48  ;;  %v819_v34 = vsel %vm817_vm11, %v807_v49, 2102212464  ;;  %v822_v47 = vsel %vm814_vm8, %v801_v48, %v804_v23  ;;  %v826_v54 = vsel %vm814_vm8, %v804_v23, %v807_v49 }
 0x206   :  { %v820_v4 = vsel %vm816_vm10, %v804_v23, %v819_v34  ;;  %v823_v14 = vsel %vm817_vm11, %v810_v8, 920167782  ;;  %v827_v57 = vsel %vm817_vm11, %v813_v51, 1326507024  ;;  %v694_v5 = vshrl.u32 %v2658_v37, %v693_v13 }
 0x207   :  { %v824_v58 = vsel %vm816_vm10, %v807_v49, %v823_v14  ;;  %v828_v60 = vsel %vm816_vm10, %v810_v8, %v827_v57  ;;  %v696_v61 = vshrl.u32 %v2659_v39, %v693_v13  ;;  %v821_v7 = vsel %vm815_vm9, %v818_v31, %v820_v4 }
 0x208   :  { %v825_v12 = vsel %vm815_vm9, %v822_v47, %v824_v58  ;;  %v829_v35 = vsel %vm815_vm9, %v826_v54, %v828_v60  ;;  %v699_v16 = vshrl.u32 %v2660_v42, %v693_v13  ;;  %v701_v29 = vshll.u32 %v2660_v42, %v692_v1 }
 0x209   :  { %v3225_v18 = vmul.u32.u64.low %v3189_v11, %v829_v35  ;;  %v3226_v27 = vmul.u32.u64.high %v3189_v11, %v829_v35, %v3225_v18  ;;  %v3229_v20 = vmul.u32.u64.low %v3189_v11, %v825_v12  ;;  %v3230_v21 = vmul.u32.u64.high %v3189_v11, %v825_v12, %v3229_v20 }
 0x20a   :  { %v697_v28 = vor.u32 %v696_v61, %v695_v25  ;;  %v700_v6 = vor.u32 %v699_v16, %v698_v43  ;;  %v702_v0 = vshrl.u32 %v2661_v44, %v693_v13  ;;  %v837_v15 = vmul.u32 %v3189_v11, %v821_v7 }
 0x20b   :  { %v704_v30 = vshll.u32 %v2661_v44, %v692_v1  ;;  %v705_v52 = vshrl.u32 %v2662_v46, %v693_v13  ;;  %v708_v32 = vshrl.u32 %v2663_v53, %v693_v13  ;;  %v707_v48 = vshll.u32 %v2662_v46, %v692_v1 }
 0x20c   :  { %v703_v40 = vor.u32 %v702_v0, %v701_v29  ;;  %vm710_vm12 = vcmp.lt.s32.totalorder %v3193_v22, 1  ;;  %vm711_vm13 = vcmp.lt.s32.totalorder %v3193_v22, 2  ;;  %vm839_vm14 = vc.u32 %v3226_v27, %v3229_v20 }
 0x20d   :  { %v840_v23 = vadd.s32 1, %v3230_v21  ;;  %v706_v49 = vor.u32 %v705_v52, %v704_v30  ;;  %vm712_vm15 = vcmp.lt.s32.totalorder %v3193_v22, 3  ;;  %v709_v11 = vor.u32 %v708_v32, %v707_v48 }
 0x20e   :  { %vm713_vm1 = vcmp.lt.s32.totalorder %v3193_v22, 4  ;;  %v714_v8 = vsel %vm710_vm12, %v694_v5, %v697_v28  ;;  %v718_v13 = vsel %vm710_vm12, %v697_v28, %v700_v6  ;;  %v722_v31 = vsel %vm710_vm12, %v700_v6, %v703_v40 }
 0x20f   :  { %v841_v51 = vsel %vm839_vm14, %v840_v23, %v3230_v21  ;;  %v715_v1 = vsel %vm713_vm1, %v703_v40, 2102212464  ;;  %v719_v25 = vsel %vm713_vm1, %v706_v49, 920167782  ;;  %v723_v4 = vsel %vm713_vm1, %v709_v11, 1326507024 }
 0x210   :  { %v842_v34 = vadd.s32 %v841_v51, %v837_v15  ;;  %v716_v47 = vsel %vm712_vm15, %v700_v6, %v715_v1  ;;  %v720_v54 = vsel %vm712_vm15, %v703_v40, %v719_v25  ;;  %v724_v43 = vsel %vm712_vm15, %v706_v49, %v723_v4 }
 0x211   :  { %v717_v14 = vsel %vm711_vm13, %v714_v8, %v716_v47  ;;  %v721_v57 = vsel %vm711_vm13, %v718_v13, %v720_v54  ;;  %vm1001_vm2 = vcmp.gt.s32.totalorder %v3199_v33, 0  ;;  %v725_v60 = vsel %vm711_vm13, %v722_v31, %v724_v43 }
 0x212   :  { %v843_v58 = vadd.s32 536870912, %v842_v34  ;;  %v3256_v5 = vmul.u32.u64.low %v3191_v17, %v721_v57  ;;  %v3257_v61 = vmul.u32.u64.high %v3191_v17, %v721_v57, %v3256_v5  ;;  %v1002_v35 = vsel %vm1001_vm2, %v3199_v33, 0 }
 0x213   :  { %v3261_v7 = vmul.u32.u64.low %v3191_v17, %v725_v60  ;;  %v3262_v12 = vmul.u32.u64.high %v3191_v17, %v725_v60, %v3261_v7  ;;  %v890_v16 = vshrl.u32 %v889_v9, 23  ;;  %v3269_v18 = vmul.f32 %v3172_v19, %v3172_v19 }
 0x214   :  { %v3271_v22 = vshrl.u32 %v843_v58, 30  ;;  %v1004_v21 = vand.u32 31, %v1002_v35  ;;  %v3275_v28 = vadd.f32 %v3185_v2, %v3183_v62  ;;  %v733_v6 = vmul.u32 %v3191_v17, %v717_v14 }
 0x215   :  { %v3280_v29 = vshll.u32 %v998_v24, 8  ;;  %v3284_v9 = vand.u32 8388607, %v886_v3  ;;  %v736_v0 = vadd.s32 1, %v3257_v61  ;;  %v1003_v15 = vshrl.u32 %v1002_v35, 5 }
 0x216   :  { %v845_v33 = vshll.u32 %v3271_v22, 30  ;;  %v1005_v30 = vsub.s32 32, %v1004_v21  ;;  %vm735_vm3 = vc.u32 %v3262_v12, %v3256_v5  ;;  %v1007_v62 = vshll.u32 %v2658_v37, %v1004_v21 }
 0x217   :  { %v1010_v2 = vshll.u32 %v2659_v39, %v1004_v21  ;;  %v2300_v41 = vadd.s32 4294967169, %v890_v16  ;;  %v737_v24 = vsel %vm735_vm3, %v736_v0, %v3257_v61  ;;  %v1013_v32 = vshll.u32 %v2660_v42, %v1004_v21 }
 0x218   :  { %v3292_v17 = vsub.s32 %v842_v34, %v845_v33  ;;  %v1008_v52 = vshrl.u32 %v2659_v39, %v1005_v30  ;;  %v738_v40 = vadd.s32 %v737_v24, %v733_v6  ;;  %v1011_v48 = vshrl.u32 %v2660_v42, %v1005_v30 }
 0x219   :  { %v1014_v23 = vshrl.u32 %v2661_v44, %v1005_v30  ;;  %v1016_v49 = vshll.u32 %v2661_v44, %v1004_v21  ;;  %v1017_v13 = vshrl.u32 %v2662_v46, %v1005_v30  ;;  %v1019_v51 = vshll.u32 %v2662_v46, %v1004_v21 }
 0x21a   :  { %v848_v11 = vsub.s32 0, %v3292_v17  ;;  %v1009_v8 = vor.u32 %v1008_v52, %v1007_v62  ;;  %v739_v1 = vadd.s32 536870912, %v738_v40  ;;  %v1012_v25 = vor.u32 %v1011_v48, %v1010_v2 }
 0x21b   :  { %v1015_v31 = vor.u32 %v1014_v23, %v1013_v32  ;;  %v1020_v34 = vshrl.u32 %v2663_v53, %v1005_v30  ;;  %v1006_v54 = vshrl.u32 %v2658_v37, %v1005_v30  ;;  %v1018_v4 = vor.u32 %v1017_v13, %v1016_v49 }
 0x21c   :  { %v2297_v47 = vmin.u32 %v848_v11, %v3292_v17  ;;  %vm1022_vm4 = vcmp.lt.s32.totalorder %v1003_v15, 1  ;;  %v740_v14 = vshrl.u32 %v739_v1, 30  ;;  %vm1024_vm5 = vcmp.lt.s32.totalorder %v1003_v15, 3 }
 0x21d   :  { %v1021_v57 = vor.u32 %v1020_v34, %v1019_v51  ;;  %vm1025_vm6 = vcmp.lt.s32.totalorder %v1003_v15, 4  ;;  %v1026_v58 = vsel %vm1022_vm4, %v1006_v54, %v1009_v8  ;;  %v1030_v61 = vsel %vm1022_vm4, %v1009_v8, %v1012_v25 }
 0x21e   :  { %v850_v43 = vclz %v2297_v47  ;;  %v1027_v60 = vsel %vm1025_vm6, %v1015_v31, 2102212464  ;;  %v741_v7 = vshll.u32 %v740_v14, 30  ;;  %v1031_v16 = vsel %vm1025_vm6, %v1018_v4, 920167782 }
 0x21f   :  { %v1028_v35 = vsel %vm1024_vm5, %v1012_v25, %v1027_v60  ;;  %v1034_v21 = vsel %vm1022_vm4, %v1012_v25, %v1015_v31  ;;  %vm1023_vm7 = vcmp.lt.s32.totalorder %v1003_v15, 2  ;;  %v1032_v33 = vsel %vm1024_vm5, %v1015_v31, %v1031_v16 }
 0x220   :  { %v2298_v6 = vadd.s32 4294967294, %v850_v43  ;;  %v1035_v0 = vsel %vm1025_vm6, %v1021_v57, 1326507024  ;;  %v3308_v30 = vsub.s32 %v738_v40, %v741_v7  ;;  %v1029_v62 = vsel %vm1023_vm7, %v1026_v58, %v1028_v35 }
 0x221   :  { %v1033_v2 = vsel %vm1023_vm7, %v1030_v61, %v1032_v33  ;;  %v1036_v24 = vsel %vm1024_vm5, %v1018_v4, %v1035_v0  ;;  %v838_v40 = vadd.s32 %v3229_v20, %v3226_v27  ;;  %v896_v51 = vadd.s32 1, %v2300_v41 }
 0x222   :  { %vm2299_vm8 = vcmp.lt.s32.totalorder %v2298_v6, 0  ;;  %v1037_v52 = vsel %vm1023_vm7, %v1034_v21, %v1036_v24  ;;  %v3312_v32 = vmul.u32.u64.low %v3280_v29, %v1033_v2  ;;  %v3313_v48 = vmul.u32.u64.high %v3280_v29, %v1033_v2, %v3312_v32 }
 0x223   :  { %v853_v23 = vsel %vm2299_vm8, 0, %v2298_v6  ;;  %v744_v49 = vsub.s32 0, %v3308_v30  ;;  %v3318_v11 = vmul.u32.u64.low %v3280_v29, %v1037_v52  ;;  %v3319_v8 = vmul.u32.u64.high %v3280_v29, %v1037_v52, %v3318_v11 }
 0x224   :  { %v854_v13 = vsub.s32 32, %v853_v23  ;;  %v858_v15 = vsub.s32 4294967266, %v853_v23  ;;  %v855_v1 = vshll.u32 %v3292_v17, %v853_v23  ;;  %v1045_v31 = vmul.u32 %v3280_v29, %v1029_v62 }
 0x225   :  { %v2293_v25 = vmin.u32 %v744_v49, %v3308_v30  ;;  %v894_v34 = vor.u32 8388608, %v3284_v9  ;;  %v1048_v4 = vadd.s32 1, %v3313_v48  ;;  %vm897_vm9 = vcmp.gt.s32.totalorder %v896_v51, 0 }
 0x226   :  { %v856_v47 = vshrl.u32 %v838_v40, %v854_v13  ;;  %v859_v54 = vadd.s32 127, %v858_v15  ;;  %vm1047_vm10 = vc.u32 %v3319_v8, %v3312_v32  ;;  %v898_v27 = vsel %vm897_vm9, %v896_v51, 0 }
 0x227   :  { %v746_v57 = vclz %v2293_v25  ;;  %v764_v20 = vsub.s32 4, %v740_v14  ;;  %vm680_vm11 = vcmp.lt.s32.totalorder %v3148_v10, 0  ;;  %v1049_v17 = vsel %vm1047_vm10, %v1048_v4, %v3313_v48 }
 0x228   :  { %v857_v41 = vor.u32 %v856_v47, %v855_v1  ;;  %v860_v43 = vshll.u32 %v859_v54, 23  ;;  %v734_v29 = vadd.s32 %v3256_v5, %v3262_v12  ;;  %v1050_v58 = vadd.s32 %v1049_v17, %v1045_v31 }
 0x229   :  { %v2294_v9 = vadd.s32 4294967294, %v746_v57  ;;  %v900_v60 = vand.u32 31, %v898_v27  ;;  %v3334_v7 = vshrl.u32 %v898_v27, 5  ;;  %v3336_v35 = vshll.u32 %v894_v34, 8 }
 0x22a   :  { %v861_v61 = vor.u32 4788187, %v860_v43  ;;  %v868_v16 = vsub.s32 4, %v3271_v22  ;;  %v1051_v21 = vadd.s32 536870912, %v1050_v58  ;;  %v3341_v33 = vsel %vm680_vm11, %v764_v20, %v740_v14 }
 0x22b   :  { %vm2295_vm12 = vcmp.lt.s32.totalorder %v2294_v9, 0  ;;  %v901_v6 = vsub.s32 32, %v900_v60  ;;  %v864_v62 = vcvt.s32.f32 %v857_v41  ;;  %v903_v12 = vshll.u32 %v2658_v37, %v900_v60 }
 0x22c   :  { %v862_v0 = vand.u32 2147483647, %v861_v61  ;;  %v749_v5 = vsel %vm2295_vm12, 0, %v2294_v9  ;;  %v3344_v52 = vshrl.u32 %v1051_v21, 30  ;;  %v906_v48 = vshll.u32 %v2659_v39, %v900_v60 }
 0x22d   :  { %v750_v2 = vsub.s32 32, %v749_v5  ;;  %v754_v24 = vsub.s32 4294967266, %v749_v5  ;;  %v751_v49 = vshll.u32 %v3308_v30, %v749_v5  ;;  %v904_v11 = vshrl.u32 %v2659_v39, %v901_v6 }
 0x22e   :  { %v865_v23 = vmul.f32 %v864_v62, %v862_v0  ;;  %v907_v40 = vshrl.u32 %v2660_v42, %v901_v6  ;;  %vm784_vm13 = vcmp.lt.s32.totalorder %v3144_v36, 0  ;;  %v1053_v15 = vshll.u32 %v3344_v52, 30 }
 0x22f   :  { %v752_v14 = vshrl.u32 %v734_v29, %v750_v2  ;;  %v755_v13 = vadd.s32 127, %v754_v24  ;;  %v910_v51 = vshrl.u32 %v2661_v44, %v901_v6  ;;  %v905_v1 = vor.u32 %v904_v11, %v903_v12 }
 0x230   :  { %v908_v25 = vor.u32 %v907_v40, %v906_v48  ;;  %v909_v31 = vshll.u32 %v2660_v42, %v900_v60  ;;  %vm918_vm14 = vcmp.lt.s32.totalorder %v3334_v7, 1  ;;  %v3355_v47 = vsub.s32 %v1050_v58, %v1053_v15 }
 0x231   :  { %v753_v34 = vor.u32 %v752_v14, %v751_v49  ;;  %v756_v30 = vshll.u32 %v755_v13, 23  ;;  %v912_v54 = vshll.u32 %v2661_v44, %v900_v60  ;;  %v913_v57 = vshrl.u32 %v2662_v46, %v901_v6 }
 0x232   :  { %v911_v4 = vor.u32 %v910_v51, %v909_v31  ;;  %v915_v27 = vshll.u32 %v2662_v46, %v900_v60  ;;  %v916_v20 = vshrl.u32 %v2663_v53, %v901_v6  ;;  %v866_v41 = vxor.u32 2147483648, %v865_v23 }
 0x233   :  { %v757_v43 = vor.u32 4788187, %v756_v30  ;;  %v1056_v17 = vsub.s32 0, %v3355_v47  ;;  %v902_v29 = vshrl.u32 %v2658_v37, %v901_v6  ;;  %v760_v9 = vcvt.s32.f32 %v753_v34 }
 0x234   :  { %v914_v61 = vor.u32 %v913_v57, %v912_v54  ;;  %v917_v21 = vor.u32 %v916_v20, %v915_v27  ;;  %vm920_vm15 = vcmp.lt.s32.totalorder %v3334_v7, 3  ;;  %vm921_vm1 = vcmp.lt.s32.totalorder %v3334_v7, 4 }
 0x235   :  { %v758_v58 = vand.u32 2147483647, %v757_v43  ;;  %v2305_v0 = vmin.u32 %v1056_v17, %v3355_v47  ;;  %v926_v60 = vsel %vm918_vm14, %v905_v1, %v908_v25  ;;  %v923_v62 = vsel %vm921_vm1, %v911_v4, 2102212464 }
 0x236   :  { %v927_v5 = vsel %vm921_vm1, %v914_v61, 920167782  ;;  %v930_v12 = vsel %vm918_vm14, %v908_v25, %v911_v4  ;;  %v931_v2 = vsel %vm921_vm1, %v917_v21, 1326507024  ;;  %vm919_vm2 = vcmp.lt.s32.totalorder %v3334_v7, 2 }
 0x237   :  { %v761_v6 = vmul.f32 %v760_v9, %v758_v58  ;;  %v1058_v24 = vclz %v2305_v0  ;;  %v928_v48 = vsel %vm920_vm15, %v911_v4, %v927_v5  ;;  %v867_v49 = vsel %vm784_vm13, %v866_v41, %v865_v23 }
 0x238   :  { %v922_v11 = vsel %vm918_vm14, %v902_v29, %v905_v1  ;;  %v929_v40 = vsel %vm919_vm2, %v926_v60, %v928_v48  ;;  %v932_v14 = vsel %vm920_vm15, %v914_v61, %v931_v2  ;;  %v924_v51 = vsel %vm920_vm15, %v908_v25, %v923_v62 }
 0x239   :  { %v762_v13 = vxor.u32 2147483648, %v761_v6  ;;  %v2306_v15 = vadd.s32 4294967294, %v1058_v24  ;;  %v933_v31 = vsel %vm919_vm2, %v930_v12, %v932_v14  ;;  %v1847_v54 = vadd.f32 %v3275_v28, %v3269_v18 }
 0x23a   :  { %v3386_v34 = vmul.u32.u64.low %v3336_v35, %v933_v31  ;;  %v3387_v23 = vmul.u32.u64.high %v3336_v35, %v933_v31, %v3386_v34  ;;  %v3390_v1 = vmul.u32.u64.low %v3336_v35, %v929_v40  ;;  %v3391_v30 = vmul.u32.u64.high %v3336_v35, %v929_v40, %v3390_v1 }
 0x23b   :  { %v763_v4 = vsel %vm680_vm11, %v762_v13, %v761_v6  ;;  %vm2307_vm3 = vcmp.lt.s32.totalorder %v2306_v15, 0  ;;  %vm3400_vm4 = vcmp.le.f32.partialorder %v678_v45, 0.7853982  ;;  %v925_v27 = vsel %vm919_vm2, %v922_v11, %v924_v51 }
 0x23c   :  { %v1061_v57 = vsel %vm2307_vm3, 0, %v2306_v15  ;;  %v766_v20 = vsel %vm3400_vm4, %v3148_v10, %v763_v4  ;;  %vm3411_vm5 = vcmp.le.f32.partialorder %v782_v38, 0.7853982  ;;  %v767_v45 = vsel %vm3400_vm4, 0, %v3341_v33 }
 0x23d   :  { %v1066_v28 = vsub.s32 4294967266, %v1061_v57  ;;  %2590 = vcosq.f32 %v766_v20  ;;  %v870_v7 = vsel %vm3411_vm5, %v3144_v36, %v867_v49  ;;  %vm943_vm6 = vc.u32 %v3387_v23, %v3390_v1 }
 0x23e   :  { %v944_v41 = vadd.s32 1, %v3391_v30  ;;  %2592 = vsinq.f32 %v766_v20  ;;  %v869_v38 = vsel %vm784_vm13, %v868_v16, %v3271_v22  ;;  %v1062_v43 = vsub.s32 32, %v1061_v57 }
 0x23f   :  { %v1067_v17 = vadd.s32 127, %v1066_v28  ;;  %v941_v33 = vmul.u32 %v3336_v35, %v925_v27  ;;  %v1046_v29 = vadd.s32 %v3312_v32, %v3319_v8  ;;  %v771_v61 = vadd.s32 3, %v767_v45 }
 0x240   :  { %v945_v9 = vsel %vm943_vm6, %v944_v41, %v3391_v30  ;;  %2594 = vcosq.f32 %v870_v7  ;;  %v871_v0 = vsel %vm3411_vm5, 0, %v869_v38  ;;  %v1848_v60 = vrot.slane %v1847_v54, 4 }
 0x241   :  { %v1068_v21 = vshll.u32 %v1067_v17, 23  ;;  %v946_v58 = vadd.s32 %v945_v9, %v941_v33  ;;  %2596 = vsinq.f32 %v870_v7  ;;  %v1064_v62 = vshrl.u32 %v1046_v29, %v1062_v43 }
 0x242   :  { %v875_v16 = vadd.s32 3, %v871_v0  ;;  %v1063_v5 = vshll.u32 %v3355_v47, %v1061_v57  ;;  %v772_v32 = vand.u32 3, %v771_v61  ;;  %v1849_v8 = vadd.f32 %v1848_v60, %v1847_v54 }
 0x243   :  { %v947_v22 = vadd.s32 536870912, %v946_v58  ;;  %v1069_v35 = vor.u32 4788187, %v1068_v21  ;;  %vm770_vm10 = vweird.f32 %v3148_v10  ;;  %vm874_vm14 = vweird.f32 %v3144_v36 }
 0x244   :  { %v1065_v6 = vor.u32 %v1064_v62, %v1063_v5  ;;  %v876_v11 = vand.u32 3, %v875_v16  ;;  %vm777_vm7 = vcmp.eq.s32.totalorder %v772_v32, 2  ;;  %v1850_v51 = vrot.slane %v1849_v8, 2 }
 0x245   :  { %v3436_v12 = vshrl.u32 %v947_v22, 30  ;;  %v1070_v40 = vand.u32 2147483647, %v1069_v35  ;;  %vm773_vm8 = vcmp.lt.s32.totalorder %v772_v32, 2  ;;  %vm774_vm9 = vcmp.eq.s32.totalorder %v772_v32, 0 }
 0x246   :  { %v1072_v34 = vcvt.s32.f32 %v1065_v6  ;;  %vm881_vm11 = vcmp.eq.s32.totalorder %v876_v11, 2  ;;  %vm878_vm12 = vcmp.eq.s32.totalorder %v876_v11, 0  ;;  %v1851_v28 = vadd.f32 %v1850_v51, %v1849_v8 }
 0x247   :  { %v2591_v2 = vpop.eup %2590  ;;  %v949_v24 = vshll.u32 %v3436_v12, 30  ;;  %vm877_vm13 = vcmp.lt.s32.totalorder %v876_v11, 2  ;;  %vm992_vm1 = vcmp.lt.s32.totalorder %v3158_v50, 0  ;;  %v942_v21 = vadd.s32 %v3390_v1, %v3387_v23 }
 0x248   :  { %v2593_v48 = vpop.eup %2592  ;;  %v778_v49 = vxor.u32 2147483648, %v2591_v2  ;;  %v1073_v27 = vmul.f32 %v1072_v34, %v1070_v40  ;;  %v1852_v10 = vrot.slane %v1851_v28, 1  ;;  %vm3448_vm2 = vcmp.le.f32.partialorder %v990_v55, 0.7853982 }
 0x249   :  { %v950_v14 = vsub.s32 %v946_v58, %v949_v24  ;;  %v775_v13 = vxor.u32 2147483648, %v2593_v48  ;;  %v1076_v23 = vsub.s32 4, %v3344_v52  ;;  %vm888_vm3 = vcmp.lt.s32.totalorder %v3169_v56, 0 }
 0x24a   :  { %v2595_v15 = vpop.eup %2594  ;;  %v779_v47 = vsel %vm777_vm7, %v778_v49, %v2593_v48  ;;  %v1074_v17 = vxor.u32 2147483648, %v1073_v27  ;;  %v1853_v0 = vadd.f32 %v1852_v10, %v1851_v28  ;;  %v972_v49 = vsub.s32 4, %v3436_v12 }
 0x24b   :  { %v2597_v31 = vpop.eup %2596  ;;  %v952_v30 = vsub.s32 0, %v950_v14  ;;  %v776_v54 = vsel %vm774_vm9, %v2591_v2, %v775_v13  ;;  %v882_v4 = vxor.u32 2147483648, %v2595_v15  ;;  %v1077_v6 = vsel %vm992_vm1, %v1076_v23, %v3344_v52 }
 0x24c   :  { %v780_v25 = vsel %vm773_vm8, %v776_v54, %v779_v47  ;;  %v879_v57 = vxor.u32 2147483648, %v2597_v31  ;;  %v1075_v61 = vsel %vm992_vm1, %v1074_v17, %v1073_v27  ;;  %v1854_v1 = vmul.f32 0.03125, %v1853_v0 }
 0x24d   :  { %v2301_v20 = vmin.u32 %v952_v30, %v950_v14  ;;  %v883_v18 = vsel %vm881_vm11, %v882_v4, %v2597_v31  ;;  %v781_v45 = vsel %vm770_vm10, nan, %v780_v25  ;;  %v1078_v5 = vsel %vm3448_vm2, %v3158_v50, %v1075_v61  ;;  %v1868_v31 = vpop.permute.xlu0 %1867 }
 0x24e   :  { %v880_v7 = vsel %vm878_vm12, %v2595_v15, %v879_v57  ;;  %2598 = vcosq.f32 %v1078_v5  ;;  %v1855_v24 = vadd.f32 1e-05, %v1854_v1  ;;  %v1079_v40 = vsel %vm3448_vm2, 0, %v1077_v6  ;;  %v1918_v6 = vld [vmem:[%s3916_s10 + $0x8] sm:$0xff] }
 0x24f   :  { %v954_v41 = vclz %v2301_v20  ;;  %v884_v38 = vsel %vm877_vm13, %v880_v7, %v883_v18  ;;  %2600 = vsinq.f32 %v1078_v5  ;;  %vm887_vm4 = vcmp.le.f32.partialorder %v886_v3, 0.7853982 }
 0x250   :  { %v885_v43 = vsel %vm874_vm14, nan, %v884_v38  ;;  %2602 = vrsqrt.f32 %v1855_v24  ;;  %v973_v15 = vsel %vm888_vm3, %v972_v49, %v3436_v12  ;;  %v1083_v51 = vadd.s32 3, %v1079_v40  ;;  %v1919_v24 = vld [vmem:[%s3916_s10 + $0x10] sm:$0xff]  ;;  %v2078_v49 = vld [vmem:[%s3917_s12] sm:$0xff] }
 0x251   :  { %v2302_v33 = vadd.s32 4294967294, %v954_v41  ;;  %v2480_v29 = vpack.c.bf16 %v885_v43, %v781_v45  ;;  %v975_v30 = vsel %vm887_vm4, 0, %v973_v15  ;;  %v1896_v20 = vpop.permute.xlu0 %1895  ;;  %vm1082_vm10 = vweird.f32 %v3158_v50  ;;  %v2309_v50 = vld [vmem:[%s3914_s4 + $0x28] sm:$0xff] }
 0x252   :  { %v1084_v54 = vand.u32 3, %v1083_v51  ;;  %v979_v25 = vadd.s32 3, %v975_v30  ;;  %vm978_vm12 = vweird.f32 %v3169_v56 }
 0x253   :  { %vm2303_vm15 = vcmp.lt.s32.totalorder %v2302_v33, 0  ;;  %2481 = vmatprep.subr.bf16.mxu1 %v2480_v29 }
 0x254   :  { %v957_v9 = vsel %vm2303_vm15, 0, %v2302_v33  ;;  %2483 = vmatpush3.bf16.msra.mxu1 %v2480_v29  ;;  %vm1086_vm5 = vcmp.eq.s32.totalorder %v1084_v54, 0  ;;  %vm1089_vm6 = vcmp.eq.s32.totalorder %v1084_v54, 2  ;;  %v980_v18 = vand.u32 3, %v979_v25 }
 0x255   :  { %v958_v58 = vsub.s32 32, %v957_v9  ;;  %v962_v36 = vsub.s32 4294967266, %v957_v9  ;;  %v959_v62 = vshll.u32 %v950_v14, %v957_v9  ;;  %v1873_v14 = vpop.permute.xlu1 %1872  ;;  %vm1085_vm7 = vcmp.lt.s32.totalorder %v1084_v54, 2  ;;  %v1878_v29 = vpop.permute.xlu0 %1877 }
 0x256   :  { %vm985_vm8 = vcmp.eq.s32.totalorder %v980_v18, 2  ;;  %vm982_vm9 = vcmp.eq.s32.totalorder %v980_v18, 0  ;;  %vm981_vm11 = vcmp.lt.s32.totalorder %v980_v18, 2 }
 0x257   :  { %v960_v22 = vshrl.u32 %v942_v21, %v958_v58  ;;  %v963_v16 = vadd.s32 127, %v962_v36 }
 0x258   :  { %v2599_v47 = vpop.eup %2598 }
 0x259   :  { %v961_v35 = vor.u32 %v960_v22, %v959_v62  ;;  %v964_v32 = vshll.u32 %v963_v16, 23  ;;  %v2601_v34 = vpop.eup %2600  ;;  %v1901_v4 = vpop.permute.xlu1 %1900  ;;  %v1090_v27 = vxor.u32 2147483648, %v2599_v47 }
 0x25a   :  { %v1087_v57 = vxor.u32 2147483648, %v2601_v34  ;;  %v2603_v3 = vpop.eup %2602 }
 0x25b   :  { %v965_v8 = vor.u32 4788187, %v964_v32  ;;  %v968_v55 = vcvt.s32.f32 %v961_v35  ;;  %v1091_v28 = vsel %vm1089_vm6, %v1090_v27, %v2601_v34  ;;  %v1858_v45 = vmul.f32 %v2603_v3, %v3150_v59  ;;  %v1906_v35 = vpop.permute.xlu0 %1905 }
 0x25c   :  { %v1088_v12 = vsel %vm1086_vm5, %v2599_v47, %v1087_v57  ;;  %v1857_v43 = vmul.f32 %v2603_v3, %v3146_v63  ;;  %v1860_v10 = vmul.f32 %v2603_v3, %v3172_v19  ;;  %v1859_v59 = vmul.f32 %v2603_v3, %v3160_v26 }
 0x25d   :  { %v966_v2 = vand.u32 2147483647, %v965_v8  ;;  %v1883_v41 = vpop.permute.xlu1 %1882  ;;  %v1092_v33 = vsel %vm1085_vm7, %v1088_v12, %v1091_v28  ;;  %v1886_v61 = vmul.f32 %v1873_v14, %v1858_v45 }
 0x25e   :  { %v1093_v36 = vsel %vm1082_vm10, nan, %v1092_v33  ;;  %v1885_v0 = vmul.f32 %v1868_v31, %v1857_v43  ;;  %v1888_v16 = vmul.f32 %v1883_v41, %v1860_v10  ;;  %v1887_v32 = vmul.f32 %v1878_v29, %v1859_v59 }
 0x25f   :  { %v969_v48 = vmul.f32 %v968_v55, %v966_v2  ;;  %v1914_v60 = vadd.f32 %v1901_v4, %v1886_v61  ;;  %v2311_v2 = vld [vmem:[%s3914_s4 + $0x38] sm:$0xff]  ;;  %v1917_v55 = vld [vmem:[%s3916_s10] sm:$0xff]  ;;  %v1107_v40 = vpop.permute.xlu0 %1106 }
 0x260   :  { %v1913_v19 = vadd.f32 %v1896_v20, %v1885_v0  ;;  %v1915_v26 = vadd.f32 %v1906_v35, %v1887_v32 }
 0x261   :  { %v970_v11 = vxor.u32 2147483648, %v969_v48  ;;  %v1911_v62 = vpop.permute.xlu1 %1910 }
 0x262   :  { %v2496_v23 = vpack.c.bf16 %v1914_v60, %v1913_v19  ;;  %v1916_v1 = vadd.f32 %v1911_v62, %v1888_v16 }
 0x263   :  { %v971_v13 = vsel %vm888_vm3, %v970_v11, %v969_v48  ;;  %v1920_v48 = vld [vmem:[%s3916_s10 + $0x18] sm:$0xff]  ;;  %v1117_v20 = vpop.permute.xlu0 %1116 }
 0x264   :  { %v974_v52 = vsel %vm887_vm4, %v3169_v56, %v971_v13  ;;  %v2310_v56 = vld [vmem:[%s3914_s4 + $0x30] sm:$0xff]  ;;  %v2500_v8 = vpack.c.bf16 %v1916_v1, %v1915_v26 }
 0x265   :  { %2604 = vcosq.f32 %v974_v52  ;;  %v1112_v11 = vpop.permute.xlu1 %1111 }
 0x266   :  { %2606 = vsinq.f32 %v974_v52 }
 0x269   :  { %v1122_v31 = vpop.permute.xlu1 %1121 }
 0x26f   :  { %v2605_v7 = vpop.eup %2604 }
 0x270   :  { %v2607_v38 = vpop.eup %2606  ;;  %v986_v17 = vxor.u32 2147483648, %v2605_v7 }
 0x271   :  { %v983_v9 = vxor.u32 2147483648, %v2607_v38 }
 0x272   :  { %v987_v21 = vsel %vm985_vm8, %v986_v17, %v2607_v38 }
 0x273   :  { %v984_v58 = vsel %vm982_vm9, %v2605_v7, %v983_v9 }
 0x274   :  { %v988_v63 = vsel %vm981_vm11, %v984_v58, %v987_v21  ;;  %v1637_v58 = vld [vmem:[%s3918_s6] sm:$0xff] }
 0x275   :  { %v989_v22 = vsel %vm978_vm12, nan, %v988_v63  ;;  %2432 = vmatprep.mubr.msk.f32.mxu0 %vm580_vm0, %v1637_v58 }
 0x276   :  { %v2484_v5 = vpack.c.bf16 %v1093_v36, %v989_v22 }
 0x278   :  { %2485 = vmatprep.subr.bf16.mxu1 %v2484_v5 }
 0x279   :  { %2487 = vmatpush3.bf16.msra.mxu1 %v2484_v5 }
 0x27a   :  { %2497 = vmatprep.subr.bf16.mxu1 %v2496_v23 }
 0x27c   :  { %2419 = vmatmul.mubr.msk.f32.vlgmr.msra.gmra.mrb[0].mxu1 %vm580_vm0, %v2309_v50 }
 0x27d   :  { %2499 = vmatpush3.bf16.msra.mxu1 %v2496_v23  ;;  %2421 = vmatprep.mubr.msk.f32.mxu1 %vm580_vm0, %v2310_v56 }
 0x27e   :  { %2501 = vmatprep.subr.bf16.mxu1 %v2500_v8 }
 0x280   :  { %2422 = vmatmul.mubr.msk.f32.gmra.mrb[2].mxu1 %vm580_vm0, %v2311_v2 }
 0x281   :  { %2503 = vmatpush3.bf16.msra.mxu1 %v2500_v8  ;;  %2452 = vmatprep.mubr.msk.f32.mxu1 %vm580_vm0, %v1917_v55 }
 0x284   :  { %2453 = vmatmul.mubr.msk.f32.vlgmr.msra.gmra.mrb[4].mxu1 %vm580_vm0, %v1918_v6 }
 0x285   :  { %2455 = vmatprep.mubr.msk.f32.mxu1 %vm580_vm0, %v1919_v24 }
 0x288   :  { %2456 = vmatmul.mubr.msk.f32.gmra.mrb[6].mxu1 %vm580_vm0, %v1920_v48 }
 0x289   :  { %2466 = vmatprep.mubr.msk.f32.mxu1 %vm580_vm0, %v2078_v49 }
 0x34f   :  { %v2420_v14 = vpop.f32.mrb[0].mxu1 }
 0x350   :  { %v3505_v13 = vadd.f32 %v2420_v14, %v1112_v11  ;;  %v1202_v15 = vpop.f32.mrb[1].mxu1 }
 0x351   :  { %v3507_v52 = vadd.f32 %v1202_v15, %v1107_v40 }
 0x352   :  { %v1325_v51 = vand.u32 2147483647, %v3505_v13  ;;  %v1328_v47 = vand.u32 2139095040, %v3505_v13 }
 0x353   :  { %v1221_v34 = vand.u32 2147483647, %v3507_v52  ;;  %v1224_v30 = vand.u32 2139095040, %v3507_v52  ;;  %v2423_v54 = vpop.f32.mrb[2].mxu1 }
 0x354   :  { %v1329_v4 = vshrl.u32 %v1328_v47, 23  ;;  %v1332_v25 = vand.u32 8388607, %v1325_v51  ;;  %v3515_v57 = vadd.f32 %v2423_v54, %v1122_v31  ;;  %v1212_v27 = vpop.f32.mrb[3].mxu1 }
 0x355   :  { %v1225_v3 = vshrl.u32 %v1224_v30, 23  ;;  %v1228_v18 = vand.u32 8388607, %v1221_v34  ;;  %v3520_v45 = vadd.f32 %v1212_v27, %v1117_v20 }
 0x356   :  { %v2324_v12 = vadd.s32 4294967169, %v1329_v4  ;;  %v1533_v28 = vand.u32 2147483647, %v3515_v57  ;;  %v1333_v7 = vor.u32 8388608, %v1332_v25  ;;  %v1536_v38 = vand.u32 2139095040, %v3515_v57 }
 0x357   :  { %v2320_v41 = vadd.s32 4294967169, %v1225_v3  ;;  %v3523_v43 = vpop.f32.mrb[4].mxu1  ;;  %v1229_v33 = vor.u32 8388608, %v1228_v18  ;;  %v1429_v21 = vand.u32 2147483647, %v3520_v45  ;;  %v1432_v59 = vand.u32 2139095040, %v3520_v45 }
 0x358   :  { %v1335_v17 = vadd.s32 1, %v2324_v12  ;;  %v1537_v10 = vshrl.u32 %v1536_v38, 23  ;;  %v3527_v9 = vand.u32 8388607, %v1533_v28  ;;  %v3529_v61 = vpop.f32.mrb[5].mxu1  ;;  %v3536_v0 = vshll.u32 %v1333_v7, 8 }
 0x359   :  { %v1231_v29 = vadd.s32 1, %v2320_v41  ;;  %v3541_v16 = vshll.u32 %v1229_v33, 8  ;;  %v3552_v8 = vshrl.u32 %v1432_v59, 23 }
 0x35a   :  { %vm1336_vm13 = vcmp.gt.s32.totalorder %v1335_v17, 0  ;;  %v2332_v60 = vadd.s32 4294967169, %v1537_v10  ;;  %v1541_v23 = vor.u32 8388608, %v3527_v9 }
 0x35b   :  { %v1337_v36 = vsel %vm1336_vm13, %v1335_v17, 0  ;;  %vm1232_vm14 = vcmp.gt.s32.totalorder %v1231_v29, 0  ;;  %v3538_v63 = vpop.f32.mrb[6].mxu1 }
 0x35c   :  { %v1338_v62 = vshrl.u32 %v1337_v36, 5  ;;  %v1339_v22 = vand.u32 31, %v1337_v36  ;;  %v1233_v19 = vsel %vm1232_vm14, %v1231_v29, 0  ;;  %v3543_v5 = vpop.f32.mrb[7].mxu1  ;;  %v3548_v1 = vadd.s32 1, %v2332_v60 }
 0x35d   :  { %v3545_v35 = vshrl.u32 %v1233_v19, 5  ;;  %v1235_v32 = vand.u32 31, %v1233_v19 }
 0x35e   :  { %v1340_v50 = vsub.s32 32, %v1339_v22  ;;  %v1342_v26 = vshll.u32 %v2658_v37, %v1339_v22  ;;  %v1345_v56 = vshll.u32 %v2659_v39, %v1339_v22  ;;  %v1348_v2 = vshll.u32 %v2660_v42, %v1339_v22 }
 0x35f   :  { %v1351_v55 = vshll.u32 %v2661_v44, %v1339_v22  ;;  %v1354_v6 = vshll.u32 %v2662_v46, %v1339_v22  ;;  %vm1357_vm15 = vcmp.lt.s32.totalorder %v1338_v62, 1  ;;  %vm1358_vm1 = vcmp.lt.s32.totalorder %v1338_v62, 2 }
 0x360   :  { %v1343_v24 = vshrl.u32 %v2659_v39, %v1340_v50  ;;  %v1346_v48 = vshrl.u32 %v2660_v42, %v1340_v50  ;;  %v1349_v49 = vshrl.u32 %v2661_v44, %v1340_v50  ;;  %v1341_v11 = vshrl.u32 %v2658_v37, %v1340_v50 }
 0x361   :  { %v1352_v40 = vshrl.u32 %v2662_v46, %v1340_v50  ;;  %v1355_v14 = vshrl.u32 %v2663_v53, %v1340_v50  ;;  %vm1359_vm2 = vcmp.lt.s32.totalorder %v1338_v62, 3  ;;  %v1236_v30 = vsub.s32 32, %v1235_v32 }
 0x362   :  { %v1344_v15 = vor.u32 %v1343_v24, %v1342_v26  ;;  %v1347_v47 = vor.u32 %v1346_v48, %v1345_v56  ;;  %v1350_v31 = vor.u32 %v1349_v49, %v1348_v2  ;;  %vm1360_vm3 = vcmp.lt.s32.totalorder %v1338_v62, 4 }
 0x363   :  { %v1353_v54 = vor.u32 %v1352_v40, %v1351_v55  ;;  %v1356_v4 = vor.u32 %v1355_v14, %v1354_v6  ;;  %v1238_v25 = vshll.u32 %v2658_v37, %v1235_v32  ;;  %v1241_v38 = vshll.u32 %v2659_v39, %v1235_v32 }
 0x364   :  { %v1361_v27 = vsel %vm1357_vm15, %v1341_v11, %v1344_v15  ;;  %v1362_v20 = vsel %vm1360_vm3, %v1350_v31, 2102212464  ;;  %v1365_v3 = vsel %vm1357_vm15, %v1344_v15, %v1347_v47  ;;  %v1369_v18 = vsel %vm1357_vm15, %v1347_v47, %v1350_v31 }
 0x365   :  { %v1363_v12 = vsel %vm1359_vm2, %v1347_v47, %v1362_v20  ;;  %v1366_v7 = vsel %vm1360_vm3, %v1353_v54, 920167782  ;;  %v1370_v41 = vsel %vm1360_vm3, %v1356_v4, 1326507024  ;;  %v1237_v29 = vshrl.u32 %v2658_v37, %v1236_v30 }
 0x366   :  { %v1367_v17 = vsel %vm1359_vm2, %v1350_v31, %v1366_v7  ;;  %v1371_v33 = vsel %vm1359_vm2, %v1353_v54, %v1370_v41  ;;  %v1239_v10 = vshrl.u32 %v2659_v39, %v1236_v30  ;;  %v1364_v59 = vsel %vm1358_vm1, %v1361_v27, %v1363_v12 }
 0x367   :  { %v1368_v58 = vsel %vm1358_vm1, %v1365_v3, %v1367_v17  ;;  %v1372_v36 = vsel %vm1358_vm1, %v1369_v18, %v1371_v33  ;;  %v1242_v60 = vshrl.u32 %v2660_v42, %v1236_v30  ;;  %v1244_v55 = vshll.u32 %v2660_v42, %v1235_v32 }
 0x368   :  { %v3578_v22 = vmul.u32.u64.low %v3536_v0, %v1372_v36  ;;  %v3579_v19 = vmul.u32.u64.high %v3536_v0, %v1372_v36, %v3578_v22  ;;  %v3582_v50 = vmul.u32.u64.low %v3536_v0, %v1368_v58  ;;  %v3583_v26 = vmul.u32.u64.high %v3536_v0, %v1368_v58, %v3582_v50 }
 0x369   :  { %v1240_v56 = vor.u32 %v1239_v10, %v1238_v25  ;;  %v1243_v2 = vor.u32 %v1242_v60, %v1241_v38  ;;  %v1245_v6 = vshrl.u32 %v2661_v44, %v1236_v30  ;;  %v1380_v24 = vmul.u32 %v3536_v0, %v1364_v59 }
 0x36a   :  { %v1247_v62 = vshll.u32 %v2661_v44, %v1235_v32  ;;  %v1248_v48 = vshrl.u32 %v2662_v46, %v1236_v30  ;;  %v1251_v49 = vshrl.u32 %v2663_v53, %v1236_v30  ;;  %v1250_v40 = vshll.u32 %v2662_v46, %v1235_v32 }
 0x36b   :  { %v1246_v11 = vor.u32 %v1245_v6, %v1244_v55  ;;  %vm1253_vm4 = vcmp.lt.s32.totalorder %v3545_v35, 1  ;;  %vm1254_vm5 = vcmp.lt.s32.totalorder %v3545_v35, 2  ;;  %vm1382_vm6 = vc.u32 %v3579_v19, %v3582_v50 }
 0x36c   :  { %v1383_v14 = vadd.s32 1, %v3583_v26  ;;  %v1249_v15 = vor.u32 %v1248_v48, %v1247_v62  ;;  %vm1255_vm7 = vcmp.lt.s32.totalorder %v3545_v35, 3  ;;  %v1252_v0 = vor.u32 %v1251_v49, %v1250_v40 }
 0x36d   :  { %vm1256_vm8 = vcmp.lt.s32.totalorder %v3545_v35, 4  ;;  %v1257_v47 = vsel %vm1253_vm4, %v1237_v29, %v1240_v56  ;;  %v1261_v31 = vsel %vm1253_vm4, %v1240_v56, %v1243_v2  ;;  %v1265_v4 = vsel %vm1253_vm4, %v1243_v2, %v1246_v11 }
 0x36e   :  { %v1384_v30 = vsel %vm1382_vm6, %v1383_v14, %v3583_v26  ;;  %v1258_v54 = vsel %vm1256_vm8, %v1246_v11, 2102212464  ;;  %v1262_v32 = vsel %vm1256_vm8, %v1249_v15, 920167782  ;;  %v1266_v3 = vsel %vm1256_vm8, %v1252_v0, 1326507024 }
 0x36f   :  { %v1385_v25 = vadd.s32 %v1384_v30, %v1380_v24  ;;  %v1259_v27 = vsel %vm1255_vm7, %v1243_v2, %v1258_v54  ;;  %v1263_v20 = vsel %vm1255_vm7, %v1246_v11, %v1262_v32  ;;  %v1267_v7 = vsel %vm1255_vm7, %v1249_v15, %v1266_v3 }
 0x370   :  { %v1260_v18 = vsel %vm1254_vm5, %v1257_v47, %v1259_v27  ;;  %v1264_v12 = vsel %vm1254_vm5, %v1261_v31, %v1263_v20  ;;  %vm1544_vm9 = vcmp.gt.s32.totalorder %v3548_v1, 0  ;;  %v1268_v38 = vsel %vm1254_vm5, %v1265_v4, %v1267_v7  ;;  %v1933_v47 = vpop.permute.xlu1 %1932 }
 0x371   :  { %v1386_v41 = vadd.s32 536870912, %v1385_v25  ;;  %v3607_v17 = vmul.u32.u64.low %v3541_v16, %v1264_v12  ;;  %v3608_v33 = vmul.u32.u64.high %v3541_v16, %v1264_v12, %v3607_v17  ;;  %v1545_v59 = vsel %vm1544_vm9, %v3548_v1, 0 }
 0x372   :  { %v3612_v29 = vmul.u32.u64.low %v3541_v16, %v1268_v38  ;;  %v3613_v10 = vmul.u32.u64.high %v3541_v16, %v1268_v38, %v3612_v29  ;;  %v3618_v58 = vand.u32 8388607, %v1429_v21  ;;  %v1547_v60 = vand.u32 31, %v1545_v59 }
 0x373   :  { %v3620_v36 = vshrl.u32 %v1386_v41, 30  ;;  %v3623_v35 = vadd.s32 %v3582_v50, %v3579_v19  ;;  %v1276_v22 = vmul.u32 %v3541_v16, %v1260_v18  ;;  %v1546_v26 = vshrl.u32 %v1545_v59, 5 }
 0x374   :  { %v3628_v56 = vshll.u32 %v1541_v23, 8  ;;  %v1279_v1 = vadd.s32 1, %v3608_v33  ;;  %v1548_v55 = vsub.s32 32, %v1547_v60  ;;  %v2328_v6 = vadd.s32 4294967169, %v3552_v8 }
 0x375   :  { %v1388_v2 = vshll.u32 %v3620_v36, 30  ;;  %vm1278_vm10 = vc.u32 %v3613_v10, %v3607_v17  ;;  %v1550_v19 = vshll.u32 %v2658_v37, %v1547_v60  ;;  %v1553_v50 = vshll.u32 %v2659_v39, %v1547_v60 }
 0x376   :  { %v1437_v16 = vor.u32 8388608, %v3618_v58  ;;  %v1280_v9 = vsel %vm1278_vm10, %v1279_v1, %v3608_v33  ;;  %v1551_v23 = vshrl.u32 %v2659_v39, %v1548_v55  ;;  %v1556_v62 = vshll.u32 %v2660_v42, %v1547_v60 }
 0x377   :  { %v3638_v24 = vsub.s32 %v1385_v25, %v1388_v2  ;;  %v1281_v48 = vadd.s32 %v1280_v9, %v1276_v22  ;;  %v1554_v8 = vshrl.u32 %v2660_v42, %v1548_v55  ;;  %v1557_v49 = vshrl.u32 %v2661_v44, %v1548_v55 }
 0x378   :  { %v1559_v11 = vshll.u32 %v2661_v44, %v1547_v60  ;;  %v1552_v14 = vor.u32 %v1551_v23, %v1550_v19  ;;  %v1560_v15 = vshrl.u32 %v2662_v46, %v1548_v55  ;;  %v1562_v0 = vshll.u32 %v2662_v46, %v1547_v60 }
 0x379   :  { %v1391_v40 = vsub.s32 0, %v3638_v24  ;;  %v1282_v31 = vadd.s32 536870912, %v1281_v48  ;;  %v1555_v30 = vor.u32 %v1554_v8, %v1553_v50  ;;  %v1558_v54 = vor.u32 %v1557_v49, %v1556_v62 }
 0x37a   :  { %v1563_v32 = vshrl.u32 %v2663_v53, %v1548_v55  ;;  %v1549_v25 = vshrl.u32 %v2658_v37, %v1548_v55  ;;  %v1561_v27 = vor.u32 %v1560_v15, %v1559_v11  ;;  %v3653_v20 = vadd.f32 %v3523_v43, %v1933_v47 }
 0x37b   :  { %v2325_v4 = vmin.u32 %v1391_v40, %v3638_v24  ;;  %v3655_v3 = vshrl.u32 %v1282_v31, 30  ;;  %vm1565_vm11 = vcmp.lt.s32.totalorder %v1546_v26, 1  ;;  %vm1568_vm12 = vcmp.lt.s32.totalorder %v1546_v26, 4 }
 0x37c   :  { %v1564_v18 = vor.u32 %v1563_v32, %v1562_v0  ;;  %vm1566_vm13 = vcmp.lt.s32.totalorder %v1546_v26, 2  ;;  %v1570_v7 = vsel %vm1568_vm12, %v1558_v54, 2102212464  ;;  %v1573_v41 = vsel %vm1565_vm11, %v1552_v14, %v1555_v30 }
 0x37d   :  { %v1393_v12 = vclz %v2325_v4  ;;  %v1284_v38 = vshll.u32 %v3655_v3, 30  ;;  %vm1567_vm14 = vcmp.lt.s32.totalorder %v1546_v26, 3  ;;  %v1574_v33 = vsel %vm1568_vm12, %v1561_v27, 920167782 }
 0x37e   :  { %v1577_v29 = vsel %vm1565_vm11, %v1555_v30, %v1558_v54  ;;  %v1569_v60 = vsel %vm1565_vm11, %v1549_v25, %v1552_v14  ;;  %v1575_v22 = vsel %vm1567_vm14, %v1558_v54, %v1574_v33  ;;  %v1578_v2 = vsel %vm1568_vm12, %v1564_v18, 1326507024 }
 0x37f   :  { %v2326_v59 = vadd.s32 4294967294, %v1393_v12  ;;  %v3658_v43 = vsub.s32 %v1281_v48, %v1284_v38  ;;  %v1571_v1 = vsel %vm1567_vm14, %v1555_v30, %v1570_v7  ;;  %v1576_v55 = vsel %vm1566_vm13, %v1573_v41, %v1575_v22  ;;  %v1928_v48 = vpop.permute.xlu0 %1927 }
 0x380   :  { %v1579_v19 = vsel %vm1567_vm14, %v1561_v27, %v1578_v2  ;;  %v3663_v9 = vmul.u32.u64.low %v3628_v56, %v1576_v55  ;;  %v3664_v23 = vmul.u32.u64.high %v3628_v56, %v1576_v55, %v3663_v9  ;;  %v1572_v15 = vsel %vm1566_vm13, %v1569_v60, %v1571_v1  ;;  %v1943_v27 = vpop.permute.xlu1 %1942 }
 0x381   :  { %vm2327_vm15 = vcmp.lt.s32.totalorder %v2326_v59, 0  ;;  %v1580_v50 = vsel %vm1566_vm13, %v1577_v29, %v1579_v19  ;;  %v1287_v8 = vsub.s32 0, %v3658_v43  ;;  %v1439_v0 = vadd.s32 1, %v2328_v6 }
 0x382   :  { %v1396_v62 = vsel %vm2327_vm15, 0, %v2326_v59  ;;  %v3669_v49 = vmul.u32.u64.low %v3628_v56, %v1580_v50  ;;  %v3670_v11 = vmul.u32.u64.high %v3628_v56, %v1580_v50, %v3669_v49  ;;  %v2047_v30 = vand.u32 2147483647, %v3653_v20 }
 0x383   :  { %v1397_v40 = vsub.s32 32, %v1396_v62  ;;  %v1401_v14 = vsub.s32 4294967266, %v1396_v62  ;;  %v1398_v47 = vshll.u32 %v3638_v24, %v1396_v62  ;;  %v2321_v31 = vmin.u32 %v1287_v8, %v3658_v43 }
 0x384   :  { %v3677_v54 = vadd.f32 %v3529_v61, %v1928_v48  ;;  %v1591_v25 = vadd.s32 1, %v3664_v23  ;;  %vm1440_vm1 = vcmp.gt.s32.totalorder %v1439_v0, 0  ;;  %v1588_v26 = vmul.u32 %v3628_v56, %v1572_v15 }
 0x385   :  { %v1399_v32 = vshrl.u32 %v3623_v35, %v1397_v40  ;;  %v1402_v4 = vadd.s32 127, %v1401_v14  ;;  %v1289_v18 = vclz %v2321_v31  ;;  %vm1590_vm2 = vc.u32 %v3670_v11, %v3663_v9 }
 0x386   :  { %v1441_v6 = vsel %vm1440_vm1, %v1439_v0, 0  ;;  %v1592_v7 = vsel %vm1590_vm2, %v1591_v25, %v3664_v23  ;;  %v3686_v61 = vadd.f32 %v3538_v63, %v1943_v27  ;;  %vm1327_vm3 = vcmp.lt.s32.totalorder %v3505_v13, 0 }
 0x387   :  { %v1400_v24 = vor.u32 %v1399_v32, %v1398_v47  ;;  %v1403_v12 = vshll.u32 %v1402_v4, 23  ;;  %v2322_v35 = vadd.s32 4294967294, %v1289_v18  ;;  %v1593_v41 = vadd.s32 %v1592_v7, %v1588_v26 }
 0x388   :  { %v3689_v38 = vshrl.u32 %v1441_v6, 5  ;;  %v1443_v33 = vand.u32 31, %v1441_v6  ;;  %vm3693_vm4 = vcmp.le.f32.partialorder %v1325_v51, 0.7853982  ;;  %v1277_v59 = vadd.s32 %v3607_v17, %v3613_v10 }
 0x389   :  { %v1404_v29 = vor.u32 4788187, %v1403_v12  ;;  %v3701_v63 = vshll.u32 %v1437_v16, 8  ;;  %v3703_v60 = vsub.f32 0.0, %v2047_v30  ;;  %v1407_v22 = vcvt.s32.f32 %v1400_v24 }
 0x38a   :  { %vm2323_vm5 = vcmp.lt.s32.totalorder %v2322_v35, 0  ;;  %v1594_v2 = vadd.s32 536870912, %v1593_v41  ;;  %v1444_v1 = vsub.s32 32, %v1443_v33  ;;  %v1446_v51 = vshll.u32 %v2658_v37, %v1443_v33 }
 0x38b   :  { %v1405_v55 = vand.u32 2147483647, %v1404_v29  ;;  %v1292_v19 = vsel %vm2323_vm5, 0, %v2322_v35  ;;  %v1449_v50 = vshll.u32 %v2659_v39, %v1443_v33  ;;  %v1452_v17 = vshll.u32 %v2660_v42, %v1443_v33 }
 0x38c   :  { %v1293_v23 = vsub.s32 32, %v1292_v19  ;;  %v1297_v62 = vsub.s32 4294967266, %v1292_v19  ;;  %v3707_v8 = vshrl.u32 %v1594_v2, 30  ;;  %vm1461_vm6 = vcmp.lt.s32.totalorder %v3689_v38, 1 }
 0x38d   :  { %v1408_v10 = vmul.f32 %v1407_v22, %v1405_v55  ;;  %v1294_v58 = vshll.u32 %v3658_v43, %v1292_v19  ;;  %v1447_v16 = vshrl.u32 %v2659_v39, %v1444_v1  ;;  %v1450_v49 = vshrl.u32 %v2660_v42, %v1444_v1 }
 0x38e   :  { %v1295_v48 = vshrl.u32 %v1277_v59, %v1293_v23  ;;  %v1298_v40 = vadd.s32 127, %v1297_v62  ;;  %v1596_v14 = vshll.u32 %v3707_v8, 30  ;;  %v1453_v15 = vshrl.u32 %v2661_v44, %v1444_v1 }
 0x38f   :  { %v1409_v0 = vxor.u32 2147483648, %v1408_v10  ;;  %v1448_v47 = vor.u32 %v1447_v16, %v1446_v51  ;;  %v1451_v31 = vor.u32 %v1450_v49, %v1449_v50  ;;  %v1455_v30 = vshll.u32 %v2661_v44, %v1443_v33 }
 0x390   :  { %v1296_v32 = vor.u32 %v1295_v48, %v1294_v58  ;;  %v1299_v4 = vshll.u32 %v1298_v40, 23  ;;  %v3717_v25 = vsub.s32 %v1593_v41, %v1596_v14  ;;  %v1454_v43 = vor.u32 %v1453_v15, %v1452_v17 }
 0x391   :  { %v1410_v39 = vsel %vm1327_vm3, %v1409_v0, %v1408_v10  ;;  %vm1223_vm7 = vcmp.lt.s32.totalorder %v3507_v52, 0  ;;  %v1456_v42 = vshrl.u32 %v2662_v46, %v1444_v1  ;;  %v1458_v27 = vshll.u32 %v2662_v46, %v1443_v33 }
 0x392   :  { %v1459_v18 = vshrl.u32 %v2663_v53, %v1444_v1  ;;  %v1413_v44 = vsel %vm3693_vm4, %v3505_v13, %v1410_v39  ;;  %vm3730_vm8 = vcmp.le.f32.partialorder %v1221_v34, 0.7853982  ;;  %v1300_v6 = vor.u32 4788187, %v1299_v4 }
 0x393   :  { %v1599_v24 = vsub.s32 0, %v3717_v25  ;;  %vm1462_vm9 = vcmp.lt.s32.totalorder %v3689_v38, 2  ;;  %v1303_v12 = vcvt.s32.f32 %v1296_v32  ;;  %v1445_v46 = vshrl.u32 %v2658_v37, %v1444_v1 }
 0x394   :  { %v1457_v7 = vor.u32 %v1456_v42, %v1455_v30  ;;  %v1460_v53 = vor.u32 %v1459_v18, %v1458_v27  ;;  %2608 = vcosq.f32 %v1413_v44  ;;  %v1301_v35 = vand.u32 2147483647, %v1300_v6 }
 0x395   :  { %v2333_v41 = vmin.u32 %v1599_v24, %v3717_v25  ;;  %vm1464_vm10 = vcmp.lt.s32.totalorder %v3689_v38, 4  ;;  %vm1463_vm11 = vcmp.lt.s32.totalorder %v3689_v38, 3  ;;  %v1469_v33 = vsel %vm1461_vm6, %v1448_v47, %v1451_v31 }
 0x396   :  { %v1466_v34 = vsel %vm1464_vm10, %v1454_v43, 2102212464  ;;  %v1470_v29 = vsel %vm1464_vm10, %v1457_v7, 920167782  ;;  %2610 = vsinq.f32 %v1413_v44  ;;  %v1304_v59 = vmul.f32 %v1303_v12, %v1301_v35 }
 0x397   :  { %v1601_v22 = vclz %v2333_v41  ;;  %v1471_v2 = vsel %vm1463_vm11, %v1454_v43, %v1470_v29  ;;  %v1465_v37 = vsel %vm1461_vm6, %v1445_v46, %v1448_v47  ;;  %v1473_v55 = vsel %vm1461_vm6, %v1451_v31, %v1454_v43  ;;  %v1938_v43 = vpop.permute.xlu0 %1937 }
 0x398   :  { %v1472_v1 = vsel %vm1462_vm9, %v1469_v33, %v1471_v2  ;;  %v1474_v19 = vsel %vm1464_vm10, %v1460_v53, 1326507024  ;;  %v1305_v51 = vxor.u32 2147483648, %v1304_v59  ;;  %v1467_v23 = vsel %vm1463_vm11, %v1451_v31, %v1466_v34 }
 0x399   :  { %v2334_v50 = vadd.s32 4294967294, %v1601_v22  ;;  %v1475_v62 = vsel %vm1463_vm11, %v1457_v7, %v1474_v19  ;;  %v3751_v10 = vmul.u32.u64.low %v3701_v63, %v1472_v1  ;;  %v3752_v58 = vmul.u32.u64.high %v3701_v63, %v1472_v1, %v3751_v10 }
 0x39a   :  { %v1476_v17 = vsel %vm1462_vm9, %v1473_v55, %v1475_v62  ;;  %v2056_v16 = vmul.f32 1.442695, %v3703_v60  ;;  %v1306_v49 = vsel %vm1223_vm7, %v1305_v51, %v1304_v59  ;;  %v1468_v0 = vsel %vm1462_vm9, %v1465_v37, %v1467_v23 }
 0x39b   :  { %vm2335_vm12 = vcmp.lt.s32.totalorder %v2334_v50, 0  ;;  %v3759_v48 = vmul.u32.u64.low %v3701_v63, %v1476_v17  ;;  %v3760_v40 = vmul.u32.u64.high %v3701_v63, %v1476_v17, %v3759_v48  ;;  %v1309_v14 = vsel %vm3730_vm8, %v3507_v52, %v1306_v49 }
 0x39c   :  { %v1604_v15 = vsel %vm2335_vm12, 0, %v2334_v50  ;;  %2612 = vpow2.f32 %v2056_v16  ;;  %v1589_v60 = vadd.s32 %v3663_v9, %v3670_v11  ;;  %v1487_v30 = vadd.s32 1, %v3752_v58 }
 0x39d   :  { %2614 = vcosq.f32 %v1309_v14  ;;  %v1605_v47 = vsub.s32 32, %v1604_v15  ;;  %v1609_v31 = vsub.s32 4294967266, %v1604_v15  ;;  %v2046_v32 = vand.u32 2147483647, %v3677_v54 }
 0x39e   :  { %2616 = vsinq.f32 %v1309_v14  ;;  %v3771_v4 = vpop.eup %2608  ;;  %v1484_v38 = vmul.u32 %v3701_v63, %v1468_v0  ;;  %vm1486_vm13 = vc.u32 %v3760_v40, %v3751_v10  ;;  %v2049_v11 = vand.u32 2147483647, %v3686_v61 }
 0x39f   :  { %v1607_v39 = vshrl.u32 %v1589_v60, %v1605_v47  ;;  %v1610_v42 = vadd.s32 127, %v1609_v31  ;;  %v1488_v27 = vsel %vm1486_vm13, %v1487_v30, %v3752_v58  ;;  %v2050_v9 = vsub.f32 0.0, %v2046_v32 }
 0x3a0   :  { %v3779_v18 = vadd.f32 %v3543_v5, %v1938_v43  ;;  %v3781_v44 = vpop.eup %2610  ;;  %v1606_v6 = vshll.u32 %v3717_v25, %v1604_v15  ;;  %v1489_v12 = vadd.s32 %v1488_v27, %v1484_v38  ;;  %v1307_v46 = vsub.s32 4, %v3655_v3 }
 0x3a1   :  { %v1611_v24 = vshll.u32 %v1610_v42, 23  ;;  %v2054_v63 = vmul.f32 1.442695, %v2050_v9  ;;  %v2053_v7 = vsub.f32 0.0, %v2049_v11  ;;  %v1411_v37 = vsub.s32 4, %v3620_v36 }
 0x3a2   :  { %v2048_v53 = vand.u32 2147483647, %v3779_v18  ;;  %v1608_v35 = vor.u32 %v1607_v39, %v1606_v6  ;;  %v1490_v34 = vadd.s32 536870912, %v1489_v12  ;;  %v1308_v5 = vsel %vm1223_vm7, %v1307_v46, %v3655_v3 }
 0x3a3   :  { %v1612_v41 = vor.u32 4788187, %v1611_v24  ;;  %2618 = vpow2.f32 %v2054_v63  ;;  %v2060_v33 = vmul.f32 1.442695, %v2053_v7  ;;  %v1310_v25 = vsel %vm3730_vm8, 0, %v1308_v5 }
 0x3a4   :  { %v2052_v29 = vsub.f32 0.0, %v2048_v53  ;;  %v3791_v22 = vshrl.u32 %v1490_v34, 30  ;;  %v1314_v2 = vadd.s32 3, %v1310_v25  ;;  %v1615_v51 = vcvt.s32.f32 %v1608_v35 }
 0x3a5   :  { %v1613_v59 = vand.u32 2147483647, %v1612_v41  ;;  %2620 = vpow2.f32 %v2060_v33  ;;  %v1412_v26 = vsel %vm1327_vm3, %v1411_v37, %v3620_v36  ;;  %v1422_v47 = vxor.u32 2147483648, %v3781_v44 }
 0x3a6   :  { %v2613_v1 = vpop.eup %2612  ;;  %v2058_v55 = vmul.f32 1.442695, %v2052_v29  ;;  %v1492_v50 = vshll.u32 %v3791_v22, 30  ;;  %v1315_v23 = vand.u32 3, %v1314_v2  ;;  %v1414_v48 = vsel %vm3693_vm4, 0, %v1412_v26 }
 0x3a7   :  { %v2615_v19 = vpop.eup %2614  ;;  %v2063_v3 = vadd.f32 1.0, %v2613_v1  ;;  %v1616_v58 = vmul.f32 %v1615_v51, %v1613_v59  ;;  %v1418_v0 = vadd.s32 3, %v1414_v48  ;;  %v1425_v36 = vxor.u32 2147483648, %v3771_v4 }
 0x3a8   :  { %v2617_v62 = vpop.eup %2616  ;;  %2622 = vpow2.f32 %v2058_v55  ;;  %v1321_v17 = vxor.u32 2147483648, %v2615_v19  ;;  %v1493_v16 = vsub.s32 %v1489_v12, %v1492_v50  ;;  %vm1320_vm14 = vcmp.eq.s32.totalorder %v1315_v23, 2 }
 0x3a9   :  { %2624 = vlog2.f32 %v2063_v3  ;;  %v1318_v49 = vxor.u32 2147483648, %v2617_v62  ;;  %vm1317_vm15 = vcmp.eq.s32.totalorder %v1315_v23, 0  ;;  %vm1316_vm1 = vcmp.lt.s32.totalorder %v1315_v23, 2 }
 0x3aa   :  { %v1495_v14 = vsub.s32 0, %v1493_v16  ;;  %v1322_v15 = vsel %vm1320_vm14, %v1321_v17, %v2617_v62  ;;  %v1419_v32 = vand.u32 3, %v1418_v0  ;;  %vm1313_vm2 = vweird.f32 %v3507_v52 }
 0x3ab   :  { %v1319_v60 = vsel %vm1317_vm15, %v2615_v19, %v1318_v49  ;;  %v1617_v39 = vxor.u32 2147483648, %v1616_v58  ;;  %vm1417_vm6 = vweird.f32 %v3505_v13  ;;  %vm1535_vm8 = vcmp.lt.s32.totalorder %v3515_v57, 0  ;;  %v1638_v13 = vld [vmem:[%s3918_s6 + $0x8] sm:$0xff] }
 0x3ac   :  { %v2329_v31 = vmin.u32 %v1495_v14, %v1493_v16  ;;  %v1323_v30 = vsel %vm1316_vm1, %v1319_v60, %v1322_v15  ;;  %vm1421_vm3 = vcmp.eq.s32.totalorder %v1419_v32, 0  ;;  %vm1420_vm4 = vcmp.lt.s32.totalorder %v1419_v32, 2 }
 0x3ad   :  { %v2619_v43 = vpop.eup %2618  ;;  %v1324_v27 = vsel %vm1313_vm2, nan, %v1323_v30  ;;  %v1423_v9 = vsel %vm1421_vm3, %v3771_v4, %v1422_v47  ;;  %vm1424_vm5 = vcmp.eq.s32.totalorder %v1419_v32, 2  ;;  %v1485_v4 = vadd.s32 %v3751_v10, %v3760_v40 }
 0x3ae   :  { %v1497_v42 = vclz %v2329_v31  ;;  %v2062_v56 = vadd.f32 1.0, %v2619_v43  ;;  %v1426_v24 = vsel %vm1424_vm5, %v1425_v36, %v3781_v44  ;;  %v1618_v41 = vsel %vm1535_vm8, %v1617_v39, %v1616_v58  ;;  %v2079_v39 = vld [vmem:[%s3917_s12 + $0x8] sm:$0xff] }
 0x3af   :  { %v2621_v38 = vpop.eup %2620  ;;  %v1427_v46 = vsel %vm1420_vm4, %v1423_v9, %v1426_v24  ;;  %vm3813_vm9 = vcmp.le.f32.partialorder %v1533_v28, 0.7853982  ;;  %v2043_v2 = vmax.f32 %v3653_v20, 0.0  ;;  %v1619_v37 = vsub.s32 4, %v3707_v8  ;;  %v2081_v9 = vld [vmem:[%s3917_s12 + $0x18] sm:$0xff] }
 0x3b0   :  { %v2330_v11 = vadd.s32 4294967294, %v1497_v42  ;;  %2626 = vlog2.f32 %v2062_v56  ;;  %v2065_v6 = vadd.f32 1.0, %v2621_v38  ;;  %v1428_v63 = vsel %vm1417_vm6, nan, %v1427_v46 }
 0x3b1   :  { %v2488_v35 = vpack.c.bf16 %v1428_v63, %v1324_v27  ;;  %v1621_v10 = vsel %vm3813_vm9, %v3515_v57, %v1618_v41  ;;  %v2042_v19 = vmax.f32 %v3677_v54, 0.0  ;;  %v2045_v17 = vmax.f32 %v3686_v61, 0.0 }
 0x3b2   :  { %v2623_v12 = vpop.eup %2622  ;;  %vm2331_vm7 = vcmp.lt.s32.totalorder %v2330_v11, 0  ;;  %2628 = vlog2.f32 %v2065_v6  ;;  %v1620_v20 = vsel %vm1535_vm8, %v1619_v37, %v3707_v8  ;;  %v1515_v49 = vsub.s32 4, %v3791_v22 }
 0x3b3   :  { %v2064_v52 = vadd.f32 1.0, %v2623_v12  ;;  %v2625_v7 = vpop.eup %2624  ;;  %v1500_v53 = vsel %vm2331_vm7, 0, %v2330_v11  ;;  %2489 = vmatprep.subr.bf16.mxu0 %v2488_v35  ;;  %v2044_v14 = vmax.f32 %v3779_v18, 0.0  ;;  %v1622_v60 = vsel %vm3813_vm9, 0, %v1620_v20 }
 0x3b4   :  { %v1501_v44 = vsub.s32 32, %v1500_v53  ;;  %v1505_v34 = vsub.s32 4294967266, %v1500_v53  ;;  %v1502_v5 = vshll.u32 %v1493_v16, %v1500_v53  ;;  %2491 = vmatpush3.bf16.msra.mxu0 %v2488_v35  ;;  %v2069_v40 = vmul.f32 0.6931472, %v2625_v7 }
 0x3b5   :  { %2630 = vlog2.f32 %v2064_v52  ;;  %vm1431_vm10 = vcmp.lt.s32.totalorder %v3520_v45, 0  ;;  %vm3834_vm11 = vcmp.le.f32.partialorder %v1429_v21, 0.7853982  ;;  %v1626_v32 = vadd.s32 3, %v1622_v60 }
 0x3b6   :  { %v1503_v33 = vshrl.u32 %v1485_v4, %v1501_v44  ;;  %v1506_v29 = vadd.s32 127, %v1505_v34  ;;  %2632 = vcosq.f32 %v1621_v10  ;;  %v2075_v55 = vadd.f32 %v2069_v40, %v2043_v2  ;;  %v2094_v40 = vpop.permute.xlu1 %2093 }
 0x3b7   :  { %2634 = vsinq.f32 %v1621_v10  ;;  %v1516_v18 = vsel %vm1431_vm10, %v1515_v49, %v3791_v22  ;;  %v2080_v22 = vld [vmem:[%s3917_s12 + $0x10] sm:$0xff]  ;;  %v1627_v42 = vand.u32 3, %v1626_v32  ;;  %vm1625_vm2 = vweird.f32 %v3515_v57  ;;  %v1640_v57 = vld [vmem:[%s3918_s6 + $0x18] sm:$0xff] }
 0x3b8   :  { %v1504_v25 = vor.u32 %v1503_v33, %v1502_v5  ;;  %v1507_v59 = vshll.u32 %v1506_v29, 23  ;;  %v1518_v21 = vsel %vm3834_vm11, 0, %v1516_v18  ;;  %vm1521_vm4 = vweird.f32 %v3520_v45  ;;  %v1639_v5 = vld [vmem:[%s3918_s6 + $0x10] sm:$0xff]  ;;  %v1642_v33 = vld [vmem:[%s3918_s6 + $0x28] sm:$0xff]  ;;  %v1644_v10 = vld [vmem:[%s3918_s6 + $0x38] sm:$0xff] }
 0x3b9   :  { %v1522_v56 = vadd.s32 3, %v1518_v21  ;;  %vm1629_vm12 = vcmp.eq.s32.totalorder %v1627_v42, 0  ;;  %vm1632_vm13 = vcmp.eq.s32.totalorder %v1627_v42, 2  ;;  %vm1628_vm14 = vcmp.lt.s32.totalorder %v1627_v42, 2  ;;  %v1643_v29 = vld [vmem:[%s3918_s6 + $0x30] sm:$0xff] }
 0x3ba   :  { %v2627_v1 = vpop.eup %2626  ;;  %v1508_v28 = vor.u32 4788187, %v1507_v59  ;;  %v1511_v23 = vcvt.s32.f32 %v1504_v25  ;;  %v2089_v25 = vpop.permute.xlu0 %2088 }
 0x3bb   :  { %v2067_v51 = vmul.f32 0.6931472, %v2627_v1  ;;  %v1523_v11 = vand.u32 3, %v1522_v56 }
 0x3bc   :  { %v2629_v50 = vpop.eup %2628  ;;  %v1509_v3 = vand.u32 2147483647, %v1508_v28 }
 0x3bd   :  { %v2074_v62 = vadd.f32 %v2067_v51, %v2042_v19  ;;  %v2073_v26 = vmul.f32 0.6931472, %v2629_v50  ;;  %vm1528_vm15 = vcmp.eq.s32.totalorder %v1523_v11, 2  ;;  %vm1525_vm1 = vcmp.eq.s32.totalorder %v1523_v11, 0 }
 0x3be   :  { %v1512_v16 = vmul.f32 %v1511_v23, %v1509_v3  ;;  %vm1524_vm3 = vcmp.lt.s32.totalorder %v1523_v11, 2  ;;  %v2099_v50 = vpop.permute.xlu0 %2098 }
 0x3bf   :  { %v2631_v58 = vpop.eup %2630  ;;  %v2077_v48 = vadd.f32 %v2073_v26, %v2045_v17  ;;  %v2504_v15 = vpack.c.bf16 %v2075_v55, %v2074_v62  ;;  %v2104_v55 = vpop.permute.xlu1 %2103 }
 0x3c0   :  { %v2071_v54 = vmul.f32 0.6931472, %v2631_v58  ;;  %v1513_v0 = vxor.u32 2147483648, %v1512_v16  ;;  %v2633_v36 = vpop.eup %2632 }
 0x3c1   :  { %2505 = vmatprep.subr.bf16.mxu1 %v2504_v15  ;;  %v2635_v43 = vpop.eup %2634  ;;  %v1633_v27 = vxor.u32 2147483648, %v2633_v36 }
 0x3c2   :  { %v2076_v61 = vadd.f32 %v2071_v54, %v2044_v14  ;;  %v1514_v47 = vsel %vm1431_vm10, %v1513_v0, %v1512_v16  ;;  %2507 = vmatpush3.bf16.msra.mxu1 %v2504_v15  ;;  %v1630_v38 = vxor.u32 2147483648, %v2635_v43  ;;  %v1656_v0 = vpop.permute.xlu0 %1655 }
 0x3c3   :  { %v1517_v31 = vsel %vm3834_vm11, %v3520_v45, %v1514_v47  ;;  %v1634_v24 = vsel %vm1632_vm13, %v1633_v27, %v2635_v43  ;;  %v1641_v45 = vld [vmem:[%s3918_s6 + $0x20] sm:$0xff]  ;;  %v1661_v60 = vpop.permute.xlu1 %1660 }
 0x3c4   :  { %v2508_v30 = vpack.c.bf16 %v2077_v48, %v2076_v61  ;;  %2636 = vcosq.f32 %v1517_v31  ;;  %v1631_v6 = vsel %vm1629_vm12, %v2633_v36, %v1630_v38 }
 0x3c5   :  { %2638 = vsinq.f32 %v1517_v31  ;;  %v1635_v63 = vsel %vm1628_vm14, %v1631_v6, %v1634_v24 }
 0x3c6   :  { %2509 = vmatprep.subr.bf16.mxu1 %v2508_v30  ;;  %v1636_v35 = vsel %vm1625_vm2, nan, %v1635_v63  ;;  %v1676_v43 = vpop.permute.xlu0 %1675 }
 0x3c7   :  { %2511 = vmatpush3.bf16.msra.mxu1 %v2508_v30 }
 0x3ca   :  { %2467 = vmatmul.mubr.msk.f32.vlgmr.msra.gmra.mrb[8].mxu1 %vm580_vm0, %v2079_v39 }
 0x3cb   :  { %2469 = vmatprep.mubr.msk.f32.mxu1 %vm580_vm0, %v2080_v22  ;;  %v1681_v22 = vpop.permute.xlu1 %1680 }
 0x3ce   :  { %2470 = vmatmul.mubr.msk.f32.gmra.mrb[10].mxu1 %vm580_vm0, %v2081_v9  ;;  %v2637_v12 = vpop.eup %2636  ;;  %v1666_v9 = vpop.permute.xlu0 %1665 }
 0x3cf   :  { %v2639_v46 = vpop.eup %2638  ;;  %v1529_v52 = vxor.u32 2147483648, %v2637_v12  ;;  %v1686_v11 = vpop.permute.xlu1 %1685 }
 0x3d0   :  { %v1526_v7 = vxor.u32 2147483648, %v2639_v46 }
 0x3d1   :  { %v1530_v4 = vsel %vm1528_vm15, %v1529_v52, %v2639_v46 }
 0x3d2   :  { %v1527_v53 = vsel %vm1525_vm1, %v2637_v12, %v1526_v7 }
 0x3d3   :  { %v1531_v41 = vsel %vm1524_vm3, %v1527_v53, %v1530_v4 }
 0x3d4   :  { %v1532_v44 = vsel %vm1521_vm4, nan, %v1531_v41 }
 0x3d5   :  { %v2492_v34 = vpack.c.bf16 %v1636_v35, %v1532_v44 }
 0x3d7   :  { %2493 = vmatprep.subr.bf16.mxu0 %v2492_v34 }
 0x3d8   :  { %2495 = vmatpush3.bf16.msra.mxu0 %v2492_v34  ;;  %v1671_v34 = vpop.permute.xlu0 %1670 }
 0x3db   :  { %2433 = vmatmul.mubr.msk.f32.vlgmr.msra.gmra.mrb[4].mxu0 %vm580_vm0, %v1638_v13 }
 0x3dc   :  { %2435 = vmatprep.mubr.msk.f32.mxu0 %vm580_vm0, %v1639_v5 }
 0x3df   :  { %2436 = vmatmul.mubr.msk.f32.gmra.mrb[6].mxu0 %vm580_vm0, %v1640_v57 }
 0x3e0   :  { %2438 = vmatprep.mubr.msk.f32.mxu0 %vm580_vm0, %v1641_v45  ;;  %v1691_v45 = vpop.permute.xlu1 %1690 }
 0x3e3   :  { %2439 = vmatmul.mubr.msk.f32.gmra.mrb[8].mxu0 %vm580_vm0, %v1642_v33 }
 0x3e4   :  { %2441 = vmatprep.mubr.msk.f32.mxu0 %vm580_vm0, %v1643_v29 }
 0x3e7   :  { %2442 = vmatmul.mubr.msk.f32.gmra.mrb[10].mxu0 %vm580_vm0, %v1644_v10  ;;  %vm2265_vm0 = vcmask 1040384  }
 0x49d   :  { %v2468_v59 = vpop.f32.mrb[8].mxu1 }
 0x49e   :  { %v3886_v2 = vadd.f32 %v2468_v59, %v2094_v40  ;;  %v2184_v37 = vpop.f32.mrb[9].mxu1 }
 0x49f   :  { %v3888_v1 = vadd.f32 %v2184_v37, %v2089_v25 }
 0x4a0   :  { %v2208_v28 = vand.u32 2147483647, %v3886_v2  ;;  %v2204_v52 = vmax.f32 %v3886_v2, 0.0 }
 0x4a1   :  { %v2207_v19 = vand.u32 2147483647, %v3888_v1  ;;  %v2471_v51 = vpop.f32.mrb[10].mxu1  ;;  %v2203_v53 = vmax.f32 %v3888_v1, 0.0 }
 0x4a2   :  { %v2212_v3 = vsub.f32 0.0, %v2208_v28  ;;  %v3892_v23 = vadd.f32 %v2471_v51, %v2104_v55  ;;  %v2194_v62 = vpop.f32.mrb[11].mxu1 }
 0x4a3   :  { %v2211_v17 = vsub.f32 0.0, %v2207_v19  ;;  %v3894_v26 = vadd.f32 %v2194_v62, %v2099_v50 }
 0x4a4   :  { %v2217_v20 = vmul.f32 1.442695, %v2212_v3  ;;  %v2210_v58 = vand.u32 2147483647, %v3892_v23  ;;  %v2206_v13 = vmax.f32 %v3892_v23, 0.0 }
 0x4a5   :  { %v2215_v16 = vmul.f32 1.442695, %v2211_v17  ;;  %v2209_v49 = vand.u32 2147483647, %v3894_v26  ;;  %v2205_v33 = vmax.f32 %v3894_v26, 0.0 }
 0x4a6   :  { %2640 = vpow2.f32 %v2217_v20  ;;  %v2214_v48 = vsub.f32 0.0, %v2210_v58 }
 0x4a7   :  { %2642 = vpow2.f32 %v2215_v16  ;;  %v2213_v14 = vsub.f32 0.0, %v2209_v49 }
 0x4a8   :  { %v2221_v54 = vmul.f32 1.442695, %v2214_v48 }
 0x4a9   :  { %v2219_v15 = vmul.f32 1.442695, %v2213_v14 }
 0x4aa   :  { %2644 = vpow2.f32 %v2221_v54 }
 0x4ab   :  { %2646 = vpow2.f32 %v2219_v15 }
 0x4ae   :  { %v2434_v61 = vpop.f32.mrb[4].mxu0 }
 0x4af   :  { %v1783_v47 = vpop.f32.mrb[5].mxu0  ;;  %v1789_v63 = vadd.f32 %v2434_v61, %v1661_v60 }
 0x4b0   :  { %v2641_v8 = vpop.eup %2640  ;;  %v1784_v35 = vadd.f32 %v1783_v47, %v1656_v0 }
 0x4b1   :  { %v2643_v18 = vpop.eup %2642  ;;  %v2224_v31 = vadd.f32 1.0, %v2641_v8 }
 0x4b2   :  { %v2223_v30 = vadd.f32 1.0, %v2643_v18  ;;  %v2437_v32 = vpop.f32.mrb[6].mxu0 }
 0x4b3   :  { %2648 = vlog2.f32 %v2224_v31  ;;  %v1793_v21 = vpop.f32.mrb[7].mxu0  ;;  %v1799_v10 = vadd.f32 %v2437_v32, %v1671_v34 }
 0x4b4   :  { %v2645_v36 = vpop.eup %2644  ;;  %2650 = vlog2.f32 %v2223_v30  ;;  %v1794_v40 = vadd.f32 %v1793_v21, %v1666_v9 }
 0x4b5   :  { %v2647_v39 = vpop.eup %2646  ;;  %v2226_v42 = vadd.f32 1.0, %v2645_v36 }
 0x4b6   :  { %v2225_v56 = vadd.f32 1.0, %v2647_v39  ;;  %v2440_v38 = vpop.f32.mrb[8].mxu0 }
 0x4b7   :  { %2652 = vlog2.f32 %v2226_v42  ;;  %v1803_v27 = vpop.f32.mrb[9].mxu0  ;;  %v1809_v4 = vadd.f32 %v2440_v38, %v1681_v22 }
 0x4b8   :  { %2654 = vlog2.f32 %v2225_v56  ;;  %v1804_v44 = vadd.f32 %v1803_v27, %v1676_v43 }
 0x4ba   :  { %v2443_v6 = vpop.f32.mrb[10].mxu0 }
 0x4bb   :  { %v1813_v24 = vpop.f32.mrb[11].mxu0  ;;  %v1819_v28 = vadd.f32 %v2443_v6, %v1691_v45 }
 0x4bc   :  { %v1814_v51 = vadd.f32 %v1813_v24, %v1686_v11 }
 0x4bd   :  { %v2649_v12 = vpop.eup %2648 }
 0x4be   :  { %v2651_v46 = vpop.eup %2650  ;;  %v2230_v7 = vmul.f32 0.6931472, %v2649_v12 }
 0x4bf   :  { %v2228_v41 = vmul.f32 0.6931472, %v2651_v46 }
 0x4c0   :  { %v2236_v5 = vadd.f32 %v2230_v7, %v2204_v52 }
 0x4c1   :  { %v2653_v57 = vpop.eup %2652  ;;  %v2235_v29 = vadd.f32 %v2228_v41, %v2203_v53 }
 0x4c2   :  { %v2655_v25 = vpop.eup %2654  ;;  %v2240_v59 = vmul.f32 %v2236_v5, %v1789_v63  ;;  %v2234_v2 = vmul.f32 0.6931472, %v2653_v57  ;;  %v2253_v37 = vmul.f32 %v2236_v5, %v1809_v4 }
 0x4c3   :  { %v2239_v1 = vmul.f32 %v2235_v29, %v1784_v35  ;;  %v2232_v55 = vmul.f32 0.6931472, %v2655_v25  ;;  %v2252_v19 = vmul.f32 %v2235_v29, %v1804_v44 }
 0x4c4   :  { %v2238_v50 = vadd.f32 %v2234_v2, %v2206_v13 }
 0x4c5   :  { %v2243_v3 = vadd.f32 %v2240_v59, %v2239_v1  ;;  %v2237_v23 = vadd.f32 %v2232_v55, %v2205_v33  ;;  %v2256_v62 = vadd.f32 %v2253_v37, %v2252_v19 }
 0x4c6   :  { %v2242_v17 = vmul.f32 %v2238_v50, %v1799_v10  ;;  %v2255_v20 = vmul.f32 %v2238_v50, %v1819_v28 }
 0x4c7   :  { %v2241_v58 = vmul.f32 %v2237_v23, %v1794_v40  ;;  %v2254_v26 = vmul.f32 %v2237_v23, %v1814_v51 }
 0x4c9   :  { %v2244_v16 = vadd.f32 %v2243_v3, %v2241_v58  ;;  %v2257_v49 = vadd.f32 %v2256_v62, %v2254_v26 }
 0x4cb   :  { %v2245_v48 = vadd.f32 %v2244_v16, %v2242_v17  ;;  %v2258_v14 = vadd.f32 %v2257_v49, %v2255_v20 }
 0x4cd   :  { %v2246_v54 = vrot.slane %v2245_v48, 4  ;;  %v2259_v15 = vrot.slane %v2258_v14, 4 }
 0x4cf   :  { %v2247_v0 = vadd.f32 %v2246_v54, %v2245_v48  ;;  %v2260_v60 = vadd.f32 %v2259_v15, %v2258_v14 }
 0x4d1   :  { %v2248_v61 = vrot.slane %v2247_v0, 2  ;;  %v2261_v8 = vrot.slane %v2260_v60, 2 }
 0x4d3   :  { %v2249_v47 = vadd.f32 %v2248_v61, %v2247_v0  ;;  %v2262_v18 = vadd.f32 %v2261_v8, %v2260_v60 }
 0x4d5   :  { %v2250_v31 = vrot.slane %v2249_v47, 1  ;;  %v2263_v30 = vrot.slane %v2262_v18, 1 }
 0x4d7   :  { %v2251_v32 = vadd.f32 %v2250_v31, %v2249_v47  ;;  %v2264_v36 = vadd.f32 %v2263_v30, %v2262_v18 }
 0x4d9   :  { %v2266_v43 = vsel %vm2265_vm0, %v2251_v32, %v2264_v36 }
 0x4da   :  { %2267 = vst [vmem:[%s3919_s14] sm:$0x3] %v2266_v43 }

</bundles_post_ra>
